<compile_context>
chip_gen: v6e
topology: v6e:2x2x1
jax: 0.10.0
libtpu: 0.0.40
codegen_flags: <defaults>
</compile_context>

<pallas_src>
import numpy as np
import jax
import jax.numpy as jnp
from jax.experimental import pallas as pl
from jax.experimental.pallas import tpu as pltpu

SCALE = 5.0  # DQNWithPrior default scale


# --------------------------- kernel ---------------------------

def make_dqn_prior_kernel(num_layers, precision, compute_dtype):
    """Fused block-MLP over one batch tile, feature-major (transposed) layout.

    x_ref : (in_dim, TB)   activations, batch on the 128-lane axis
    w_k   : (out_k, in_k)  fused weight (PyTorch layout), compute dtype
    b_k   : (out_k, 1)     fused bias, f32
    o_ref : (out_dim, TB)  lane-dense output tile
    """

    def kernel(x_ref, *refs):
        o_ref = refs[-1]
        params = refs[:-1]          # (w1, b1, w2, b2, ..., wL, bL)
        h = x_ref[...]              # (in_dim, TB), compute_dtype
        for li in range(num_layers):
            w = params[2 * li][...]
            b = params[2 * li + 1][...]
            # f32 accumulation regardless of operand dtype.
            h = jnp.dot(w, h, precision=precision,
                        preferred_element_type=jnp.float32) + b
            if li < num_layers - 1:
                h = jnp.maximum(h, 0.0)
                # Keep the next MXU pass single-pass native bf16 (no-op for
                # the f32 verification path).
                h = h.astype(compute_dtype)
        o_ref[...] = h.astype(o_ref.dtype)

    return kernel


# ----------------- host-side algebraic fusion -----------------

def fuse_dqn_prior_params(diff_params, prior_params, scale):
    """Fuse f_diff and f_prior (same dimensions) into one block network.

    Params are in PyTorch layout: W (out, in), b (out, 1).  Running the single
    fused MLP equals f_diff(x) + scale * f_prior(x) exactly (in f32).
    """
    L = len(diff_params)
    fused = []
    for li, ((wd, bd), (wp, bp)) in enumerate(zip(diff_params, prior_params)):
        first, last = (li == 0), (li == L - 1)
        if first and last:
            fused.append((wd + scale * wp, bd + scale * bp))
        elif first:
            w = jnp.concatenate([wd, wp], axis=0)              # (Hd+Hp, in)
            b = jnp.concatenate([bd, bp], axis=0)              # (Hd+Hp, 1)
            fused.append((w, b))
        elif last:
            w = jnp.concatenate([wd, scale * wp], axis=1)      # (out, Hd+Hp)
            b = bd + scale * bp
            fused.append((w, b))
        else:
            z_tr = jnp.zeros((wd.shape[0], wp.shape[1]), wd.dtype)
            z_bl = jnp.zeros((wp.shape[0], wd.shape[1]), wd.dtype)
            w = jnp.concatenate(
                [jnp.concatenate([wd, z_tr], axis=1),
                 jnp.concatenate([z_bl, wp], axis=1)], axis=0)  # block-diag
            b = jnp.concatenate([bd, bp], axis=0)
            fused.append((w, b))
    return fused


# --------------------------- wrapper ---------------------------

def dqn_with_prior(x, diff_params, prior_params, scale=SCALE,
                   block_batch=2048, use_bf16=True, min_pallas_batch=128):
    """out = f_diff(x) + scale * f_prior(x), via one fused Pallas kernel.

    diff_params / prior_params: lists of (W, b) with W:(out,in), b:(out,1)
    (PyTorch nn.Linear layout).

    use_bf16=True (default): single-pass bf16 MXU path, f32 accumulation
      (relative error ~1e-2 vs an f32 reference — the usual bf16 rounding).
    use_bf16=False: exact f32 path (Precision.HIGHEST) for verification.
    """
    B, in_dim = x.shape
    fused = fuse_dqn_prior_params(diff_params, prior_params, scale)
    num_layers = len(fused)
    out_dim = fused[-1][0].shape[0]
    out_dtype = x.dtype

    # ---- tiny-batch bypass: pallas_call overhead dominates, run plain XLA.
    if B < min_pallas_batch:
        hp = jax.lax.Precision.HIGHEST
        h = x
        for li, (w, b) in enumerate(fused):
            h = jnp.dot(h, w.T, precision=hp) + b[:, 0]
            if li < num_layers - 1:
                h = jnp.maximum(h, 0.0)
        return h.astype(out_dtype)

    compute_dtype = jnp.bfloat16 if use_bf16 else jnp.float32
    # bf16 operands -> DEFAULT precision is the single-pass native MXU path.
    # f32 verification path keeps HIGHEST (exact, known-good lowering).
    precision = (jax.lax.Precision.DEFAULT if use_bf16
                 else jax.lax.Precision.HIGHEST)

    # Feature-major layout: batch on the 128-lane axis => lane-dense loads
    # and unmasked, lane-dense stores of the (out_dim, TB) output tile.
    xT = x.T.astype(compute_dtype)                      # (in_dim, B)

    # Batch tile: multiple of 128 (lane dim), capped at block_batch.
    b_round = ((B + 127) // 128) * 128
    tb = max(128, (min(block_batch, b_round) // 128) * 128)
    n_tiles = pl.cdiv(B, tb)
    bp = n_tiles * tb
    if bp != B:
        xT = jnp.pad(xT, ((0, 0), (0, bp - B)))

    flat = []
    for w, b in fused:
        flat.append(w.astype(compute_dtype))            # weights in MXU dtype
        flat.append(b.astype(jnp.float32))               # biases stay f32

    # x / out are tiled over batch (lane axis); fused weights & biases stay
    # resident in VMEM across all grid steps (constant index_map).
    in_specs = [pl.BlockSpec((in_dim, tb), lambda i: (0, i))]
    in_specs += [pl.BlockSpec(a.shape, lambda i: (0, 0)) for a in flat]
    out_spec = pl.BlockSpec((out_dim, tb), lambda i: (0, i))

    layer_flops = sum(2 * w.shape[0] * w.shape[1] for w, _ in fused)
    cost = pl.CostEstimate(
        flops=int(bp) * int(layer_flops),
        transcendentals=0,
        bytes_accessed=int(xT.size * xT.dtype.itemsize
                           + bp * out_dim * np.dtype(out_dtype).itemsize
                           + sum(int(a.size) * a.dtype.itemsize for a in flat)))

    # TODO(synk): on v7x, if a profile shows one TensorCore idle, switch to an
    # explicit leading grid axis with pltpu.CORE_PARALLEL (or pl.core_map).
    outT = pl.pallas_call(
        make_dqn_prior_kernel(num_layers, precision, compute_dtype),
        out_shape=jax.ShapeDtypeStruct((out_dim, bp), out_dtype),
        grid=(n_tiles,),
        in_specs=in_specs,
        out_specs=out_spec,
        compiler_params=pltpu.CompilerParams(
            dimension_semantics=("parallel",)),
        cost_estimate=cost,
    )(xT, *flat)

    return outT[:, :B].T


# ---------------- deterministic parameter construction ----------------

def xavier_uniform(key, in_dim, out_dim):
    """Glorot/Xavier uniform, matching MLP.initialize(); PyTorch (out,in) layout."""
    limit = np.sqrt(6.0 / (in_dim + out_dim))
    return jax.random.uniform(key, (out_dim, in_dim), jnp.float32,
                              minval=-limit, maxval=limit)


def make_mlp_params(key, dimensions, bias_fill=0.1):
    params = []
    for i in range(len(dimensions) - 1):
        key, sub = jax.random.split(key)
        w = xavier_uniform(sub, dimensions[i], dimensions[i + 1])
        b = jnp.full((dimensions[i + 1], 1), bias_fill, jnp.float32)
        params.append((w, b))
    return params


def reference_forward(x, diff_params, prior_params, scale=SCALE):
    """Pure-JAX reference matching the PyTorch module semantics (f32, exact)."""
    hp = jax.lax.Precision.HIGHEST

    def mlp(h, params):
        for (w, b) in params[:-1]:
            h = jnp.maximum(jnp.dot(h, w.T, precision=hp) + b[:, 0], 0.0)
        w, b = params[-1]
        return jnp.dot(h, w.T, precision=hp) + b[:, 0]

    return mlp(x, diff_params) + scale * mlp(x, prior_params)


if __name__ == "__main__":
    # dimensions of the MLPs: [input, hidden, hidden, output]
    dimensions = [32, 64, 64, 8]
    batch = 8

    key = jax.random.PRNGKey(0)
    kx, kd, kp = jax.random.split(key, 3)

    x = jax.random.normal(kx, (batch, dimensions[0]), jnp.float32)

    # f_diff: Xavier weights, bias = 0.1 (MLP.initialize()).
    diff_params = make_mlp_params(kd, dimensions, bias_fill=0.1)
    # f_prior: independently (deterministically) initialized, frozen weights.
    prior_params = make_mlp_params(kp, dimensions, bias_fill=0.1)

    ref = reference_forward(x, diff_params, prior_params)

    # 1) Pallas kernel, exact f32 path (forced past the tiny-batch bypass).
    out_f32 = dqn_with_prior(x, diff_params, prior_params,
                             use_bf16=False, min_pallas_batch=0)
    out_f32 = jax.block_until_ready(out_f32)
    assert out_f32.shape == (batch, dimensions[-1])
    np.testing.assert_allclose(np.asarray(out_f32), np.asarray(ref),
                               rtol=1e-4, atol=1e-4)

    # 2) Pallas kernel, default bf16 single-pass MXU path (relaxed tolerance:
    #    the only error source is bf16 rounding of x / weights).
    out_bf16 = dqn_with_prior(x, diff_params, prior_params,
                              min_pallas_batch=0)
    out_bf16 = jax.block_until_ready(out_bf16)
    assert out_bf16.shape == (batch, dimensions[-1])
    np.testing.assert_allclose(np.asarray(out_bf16), np.asarray(ref),
                               rtol=5e-2, atol=1e-1)

    # 3) Default call at B=8 takes the tiny-batch XLA fallback (exact f32).
    out_small = dqn_with_prior(x, diff_params, prior_params)
    out_small = jax.block_until_ready(out_small)
    np.testing.assert_allclose(np.asarray(out_small), np.asarray(ref),
                               rtol=1e-4, atol=1e-4)

    print("KERNEL_OK")
</pallas_src>

<mosaic_0001>
module attributes {stable_mosaic.version = 11 : i64} {
  func.func @kernel(%arg0: i32, %arg1: memref<32x128xf32, #tpu.memory_space<vmem>>, %arg2: memref<128x32xf32, #tpu.memory_space<vmem>>, %arg3: memref<128x1xf32, #tpu.memory_space<vmem>>, %arg4: memref<128x128xf32, #tpu.memory_space<vmem>>, %arg5: memref<128x1xf32, #tpu.memory_space<vmem>>, %arg6: memref<8x128xf32, #tpu.memory_space<vmem>>, %arg7: memref<8x1xf32, #tpu.memory_space<vmem>>, %arg8: memref<8x128xf32, #tpu.memory_space<vmem>>) attributes {dimension_semantics = [#tpu.dimension_semantics<parallel>], iteration_bounds = array<i64: 1>, scalar_prefetch = 0 : i64, scratch_operands = 0 : i64, tpu.core_type = #tpu.core_type<tc>, window_params = [{transform_indices = @transform_0, window_bounds = array<i64: 32, 128>}, {pipeline_mode = #tpu.pipeline_mode<synchronous>, transform_indices = @transform_1, window_bounds = array<i64: 128, 32>}, {pipeline_mode = #tpu.pipeline_mode<synchronous>, transform_indices = @transform_2, window_bounds = array<i64: 128, 1>}, {pipeline_mode = #tpu.pipeline_mode<synchronous>, transform_indices = @transform_3, window_bounds = array<i64: 128, 128>}, {pipeline_mode = #tpu.pipeline_mode<synchronous>, transform_indices = @transform_4, window_bounds = array<i64: 128, 1>}, {pipeline_mode = #tpu.pipeline_mode<synchronous>, transform_indices = @transform_5, window_bounds = array<i64: 8, 128>}, {pipeline_mode = #tpu.pipeline_mode<synchronous>, transform_indices = @transform_6, window_bounds = array<i64: 8, 1>}, {transform_indices = @transform_7, window_bounds = array<i64: 8, 128>}]} {
    %c0 = arith.constant 0 : index
    %c0_0 = arith.constant 0 : index
    %0 = vector.load %arg1[%c0, %c0_0] : memref<32x128xf32, #tpu.memory_space<vmem>>, vector<32x128xf32>
    %c0_1 = arith.constant 0 : index
    %c0_2 = arith.constant 0 : index
    %1 = vector.load %arg2[%c0_1, %c0_2] : memref<128x32xf32, #tpu.memory_space<vmem>>, vector<128x32xf32>
    %c0_3 = arith.constant 0 : index
    %c0_4 = arith.constant 0 : index
    %2 = vector.load %arg3[%c0_3, %c0_4] : memref<128x1xf32, #tpu.memory_space<vmem>>, vector<128x1xf32>
    %cst = arith.constant dense<0.000000e+00> : vector<128x128xf32>
    %3 = tpu.matmul %1, %0, %cst {dimension_numbers = #tpu.dot_dimension_numbers<[1], [0], [0], [1], [0, 0, 1, 1], [], []>, precision = #tpu.contract_precision<fp32>} : vector<128x32xf32>, vector<32x128xf32>, vector<128x128xf32> -> vector<128x128xf32>
    %4 = vector.broadcast %2 : vector<128x1xf32> to vector<128x128xf32>
    %5 = arith.addf %3, %4 : vector<128x128xf32>
    %cst_5 = arith.constant 0.000000e+00 : f32
    %6 = vector.broadcast %cst_5 : f32 to vector<128x128xf32>
    %7 = arith.maximumf %5, %6 : vector<128x128xf32>
    %c0_6 = arith.constant 0 : index
    %c0_7 = arith.constant 0 : index
    %8 = vector.load %arg4[%c0_6, %c0_7] : memref<128x128xf32, #tpu.memory_space<vmem>>, vector<128x128xf32>
    %c0_8 = arith.constant 0 : index
    %c0_9 = arith.constant 0 : index
    %9 = vector.load %arg5[%c0_8, %c0_9] : memref<128x1xf32, #tpu.memory_space<vmem>>, vector<128x1xf32>
    %cst_10 = arith.constant dense<0.000000e+00> : vector<128x128xf32>
    %10 = tpu.matmul %8, %7, %cst_10 {dimension_numbers = #tpu.dot_dimension_numbers<[1], [0], [0], [1], [0, 0, 1, 1], [], []>, precision = #tpu.contract_precision<fp32>} : vector<128x128xf32>, vector<128x128xf32>, vector<128x128xf32> -> vector<128x128xf32>
    %11 = vector.broadcast %9 : vector<128x1xf32> to vector<128x128xf32>
    %12 = arith.addf %10, %11 : vector<128x128xf32>
    %cst_11 = arith.constant 0.000000e+00 : f32
    %13 = vector.broadcast %cst_11 : f32 to vector<128x128xf32>
    %14 = arith.maximumf %12, %13 : vector<128x128xf32>
    %c0_12 = arith.constant 0 : index
    %c0_13 = arith.constant 0 : index
    %15 = vector.load %arg6[%c0_12, %c0_13] : memref<8x128xf32, #tpu.memory_space<vmem>>, vector<8x128xf32>
    %c0_14 = arith.constant 0 : index
    %c0_15 = arith.constant 0 : index
    %16 = vector.load %arg7[%c0_14, %c0_15] : memref<8x1xf32, #tpu.memory_space<vmem>>, vector<8x1xf32>
    %cst_16 = arith.constant dense<0.000000e+00> : vector<8x128xf32>
    %17 = tpu.matmul %15, %14, %cst_16 {dimension_numbers = #tpu.dot_dimension_numbers<[1], [0], [0], [1], [0, 0, 1, 1], [], []>, precision = #tpu.contract_precision<fp32>} : vector<8x128xf32>, vector<128x128xf32>, vector<8x128xf32> -> vector<8x128xf32>
    %18 = vector.broadcast %16 : vector<8x1xf32> to vector<8x128xf32>
    %19 = arith.addf %17, %18 : vector<8x128xf32>
    %c0_17 = arith.constant 0 : index
    %c0_18 = arith.constant 0 : index
    %20 = vector.load %arg8[%c0_17, %c0_18] : memref<8x128xf32, #tpu.memory_space<vmem>>, vector<8x128xf32>
    tpu.vector_store %arg8[%c0_17, %c0_18], %19 {strides = array<i32>} : memref<8x128xf32, #tpu.memory_space<vmem>>, vector<8x128xf32>,
    return
  }
  func.func @transform_0(%arg0: i32) -> (i32, i32) {
    %c0_i32 = arith.constant 0 : i32
    %c0_i32_0 = arith.constant 0 : i32
    return %c0_i32, %arg0 : i32, i32
  }
  func.func @transform_1(%arg0: i32) -> (i32, i32) {
    %c0_i32 = arith.constant 0 : i32
    %c0_i32_0 = arith.constant 0 : i32
    %c0_i32_1 = arith.constant 0 : i32
    return %c0_i32, %c0_i32_0 : i32, i32
  }
  func.func @transform_2(%arg0: i32) -> (i32, i32) {
    %c0_i32 = arith.constant 0 : i32
    %c0_i32_0 = arith.constant 0 : i32
    %c0_i32_1 = arith.constant 0 : i32
    return %c0_i32, %c0_i32_0 : i32, i32
  }
  func.func @transform_3(%arg0: i32) -> (i32, i32) {
    %c0_i32 = arith.constant 0 : i32
    %c0_i32_0 = arith.constant 0 : i32
    %c0_i32_1 = arith.constant 0 : i32
    return %c0_i32, %c0_i32_0 : i32, i32
  }
  func.func @transform_4(%arg0: i32) -> (i32, i32) {
    %c0_i32 = arith.constant 0 : i32
    %c0_i32_0 = arith.constant 0 : i32
    %c0_i32_1 = arith.constant 0 : i32
    return %c0_i32, %c0_i32_0 : i32, i32
  }
  func.func @transform_5(%arg0: i32) -> (i32, i32) {
    %c0_i32 = arith.constant 0 : i32
    %c0_i32_0 = arith.constant 0 : i32
    %c0_i32_1 = arith.constant 0 : i32
    return %c0_i32, %c0_i32_0 : i32, i32
  }
  func.func @transform_6(%arg0: i32) -> (i32, i32) {
    %c0_i32 = arith.constant 0 : i32
    %c0_i32_0 = arith.constant 0 : i32
    %c0_i32_1 = arith.constant 0 : i32
    return %c0_i32, %c0_i32_0 : i32, i32
  }
  func.func @transform_7(%arg0: i32) -> (i32, i32) {
    %c0_i32 = arith.constant 0 : i32
    %c0_i32_0 = arith.constant 0 : i32
    return %c0_i32, %arg0 : i32, i32
  }
}

</mosaic_0001>

<bundles_post_ra>
// kernel: tpu_custom_call.1
= control target key start
LH: loop header
LB: loop body
LE: loop exit
PB: predicated region body
PF: predicated region fallthrough
CT: control target
= control target key end

     0   :  { %vm143_vm0 = vcmask 261120   ;;  %v4595_v9 = vmov 0   ;;  %s6420_s0 = inlined_call_operand.vmem [shape: f32[32,128], index: 0, kind: input, shape index: {}]   ;;  %s6421_s1 = inlined_call_operand.vmem [shape: f32[128,32], index: 1, kind: input, shape index: {}]   ;;  %s6422_s2 = inlined_call_operand.vmem [shape: f32[128,1], index: 2, kind: input, shape index: {}]   ;;  %s6423_s3 = inlined_call_operand.vmem [shape: f32[128,128], index: 3, kind: input, shape index: {}]   ;;  %s6424_s4 = inlined_call_operand.vmem [shape: f32[128,1], index: 4, kind: input, shape index: {}]   ;;  %s6425_s5 = inlined_call_operand.vmem [shape: f32[8,128], index: 5, kind: input, shape index: {}]   ;;  %s6426_s6 = inlined_call_operand.vmem [shape: f32[8,1], index: 6, kind: input, shape index: {}]   ;;  %s6427_s7 = inlined_call_operand.hbm [shape: f32[8,128], index: 7, kind: output, shape index: {}]  }
   0x1   :  { %v30_v0 = vld [vmem:[%s6420_s0 + $0x18] sm:$0xff]  ;;  %v29_v1 = vld [vmem:[%s6420_s0 + $0x10] sm:$0xff]  ;;  %v28_v2 = vld [vmem:[%s6420_s0 + $0x8] sm:$0xff]  ;;  %4572 = vset.pattern.permute.xlu1 %v4595_v9  ;;  %4571 = vset.pattern.permute.xlu0 %v4595_v9 }
   0x2   :  { %v4648_v3 = vand.u32 4294901760, %v30_v0  ;;  %v4650_v4 = vand.u32 4294901760, %v29_v1  ;;  %v4652_v5 = vand.u32 4294901760, %v28_v2  ;;  %v27_v6 = vld [vmem:[%s6420_s0] sm:$0xff]  ;;  %v32_v8 = vld [vmem:[%s6421_s1 + $0x8] sm:$0xff]  ;;  %v33_v13 = vld [vmem:[%s6421_s1 + $0x10] sm:$0xff] }
   0x3   :  { %v31_v7 = vld [vmem:[%s6421_s1] sm:$0xff]  ;;  %v4663_v10 = vand.u32 4294901760, %v27_v6  ;;  %v148_v12 = vsel %vm143_vm0, %v32_v8, 0  ;;  %v34_v14 = vld [vmem:[%s6421_s1 + $0x18] sm:$0xff]  ;;  %v151_v20 = vsel %vm143_vm0, %v33_v13, 0  ;;  %v60_v36 = vld [vmem:[%s6422_s2 + $0x68] sm:$0xff] }
   0x4   :  { %v145_v11 = vsel %vm143_vm0, %v31_v7, 0  ;;  %3829 = vmatprep.subr.mxu0 %v4648_v3  ;;  %v4675_v15 = vsub.f32 %v30_v0, %v4648_v3  ;;  %v4679_v17 = vand.u32 4294901760, %v148_v12  ;;  %v4682_v18 = vsub.f32 %v29_v1, %v4650_v4  ;;  %v62_v35 = vld [vmem:[%s6422_s2 + $0x78] sm:$0xff]  ;;  %v35_v41 = vld [vmem:[%s6421_s1 + $0x20] sm:$0xff]  ;;  %v36_v42 = vld [vmem:[%s6421_s1 + $0x28] sm:$0xff]  ;;  %130 = vperm.xlu1 %4572, %v60_v36  }
   0x5   :  { %v4677_v16 = vand.u32 4294901760, %v145_v11  ;;  %3830 = vmatpush3.msra.mxu0 %v4648_v3  ;;  %v4686_v19 = vsub.f32 %v28_v2, %v4652_v5  ;;  %v154_v21 = vsel %vm143_vm0, %v34_v14, 0  ;;  %v4691_v22 = vsub.f32 %v27_v6, %v4663_v10  ;;  %v37_v47 = vld [vmem:[%s6421_s1 + $0x30] sm:$0xff]  ;;  %v38_v48 = vld [vmem:[%s6421_s1 + $0x38] sm:$0xff]  ;;  %140 = vperm.xlu0 %4571, %v62_v35   ;;  %v39_v53 = vld [vmem:[%s6421_s1 + $0x40] sm:$0xff] }
   0x6   :  { %3831 = vmatprep.subr.mxu0 %v4650_v4  ;;  %v4695_v23 = vand.u32 4294901760, %v4675_v15  ;;  %v4701_v25 = vsub.f32 %v148_v12, %v4679_v17  ;;  %v4704_v26 = vand.u32 4294901760, %v4682_v18  ;;  %v4711_v28 = vand.u32 4294901760, %v151_v20  ;;  %v40_v54 = vld [vmem:[%s6421_s1 + $0x48] sm:$0xff]  ;;  %v41_v6 = vld [vmem:[%s6421_s1 + $0x50] sm:$0xff]  ;;  %v42_v7 = vld [vmem:[%s6421_s1 + $0x58] sm:$0xff] }
   0x7   :  { %v4698_v24 = vsub.f32 %v145_v11, %v4677_v16  ;;  %3869 = vmatprep.mubr.f32.mxu1 %v4677_v16  ;;  %3832 = vmatpush3.msra.mxu0 %v4650_v4  ;;  %v4709_v27 = vand.u32 4294901760, %v4686_v19  ;;  %v4713_v29 = vand.u32 4294901760, %v154_v21  ;;  %v4716_v30 = vand.u32 4294901760, %v4691_v22 }
   0x8   :  { %3833 = vmatprep.subr.mxu0 %v4652_v5  ;;  %v449_v31 = vsub.f32 %v4675_v15, %v4695_v23  ;;  %v273_v33 = vand.u32 4294901760, %v4701_v25  ;;  %v456_v34 = vsub.f32 %v4682_v18, %v4704_v26  ;;  %v4735_v38 = vsub.f32 %v151_v20, %v4711_v28 }
   0x9   :  { %v263_v32 = vand.u32 4294901760, %v4698_v24  ;;  %3834 = vmatpush3.msra.mxu0 %v4652_v5  ;;  %v463_v37 = vsub.f32 %v4686_v19, %v4709_v27  ;;  %v4738_v39 = vsub.f32 %v154_v21, %v4713_v29  ;;  %v470_v40 = vsub.f32 %v4691_v22, %v4716_v30 }
   0xa   :  { %3835 = vmatprep.subr.mxu0 %v4663_v10  ;;  %v450_v43 = vand.u32 4294901760, %v449_v31  ;;  %v274_v45 = vsub.f32 %v4701_v25, %v273_v33  ;;  %v457_v46 = vand.u32 4294901760, %v456_v34  ;;  %v283_v50 = vand.u32 4294901760, %v4735_v38 }
   0xb   :  { %v264_v44 = vsub.f32 %v4698_v24, %v263_v32  ;;  %3836 = vmatpush3.msra.mxu0 %v4663_v10  ;;  %v464_v49 = vand.u32 4294901760, %v463_v37  ;;  %v293_v51 = vand.u32 4294901760, %v4738_v39  ;;  %v471_v52 = vand.u32 4294901760, %v470_v40 }
   0xc   :  { %3861 = vmatprep.subr.mxu1 %v450_v43  ;;  %v275_v56 = vand.u32 4294901760, %v274_v45  ;;  %3893 = vmatprep.subr.mxu0 %v4675_v15  ;;  %v157_v57 = vsel %vm143_vm0, %v35_v41, 0  ;;  %v160_v58 = vsel %vm143_vm0, %v36_v42, 0  ;;  %v284_v59 = vsub.f32 %v4735_v38, %v283_v50 }
   0xd   :  { %v265_v55 = vand.u32 4294901760, %v264_v44  ;;  %3862 = vmatpush3.msra.mxu1 %v450_v43  ;;  %v294_v60 = vsub.f32 %v4738_v39, %v293_v51  ;;  %v4779_v61 = vand.u32 4294901760, %v157_v57  ;;  %v4781_v62 = vand.u32 4294901760, %v160_v58 }
   0xe   :  { %3863 = vmatprep.subr.mxu1 %v457_v46  ;;  %v163_v63 = vsel %vm143_vm0, %v37_v47, 0  ;;  %v166_v0 = vsel %vm143_vm0, %v38_v48, 0  ;;  %v169_v1 = vsel %vm143_vm0, %v39_v53, 0  ;;  %v172_v2 = vsel %vm143_vm0, %v40_v54, 0  ;;  %v44_v53 = vld [vmem:[%s6421_s1 + $0x68] sm:$0xff] }
   0xf   :  { %3837 = vmatprep.mubr.f32.mxu0 %v265_v55  ;;  %3864 = vmatpush3.msra.mxu1 %v457_v46  ;;  %v285_v8 = vand.u32 4294901760, %v284_v59  ;;  %v295_v9 = vand.u32 4294901760, %v294_v60  ;;  %v4794_v11 = vsub.f32 %v157_v57, %v4779_v61  ;;  %v4797_v12 = vsub.f32 %v160_v58, %v4781_v62 }
  0x10   :  { %3838 = vmatmul.mubr.f32.vlgmr.msra.gmra.mxu0 %v275_v56  ;;  %3865 = vmatprep.subr.mxu1 %v464_v49  ;;  %v4800_v13 = vand.u32 4294901760, %v163_v63  ;;  %v4802_v14 = vand.u32 4294901760, %v166_v0  ;;  %v4804_v20 = vand.u32 4294901760, %v169_v1  ;;  %v4806_v21 = vand.u32 4294901760, %v172_v2 }
  0x11   :  { %3894 = vmatpush3.msra.mxu0 %v4675_v15  ;;  %3840 = vmatprep.mubr.f32.mxu0 %v285_v8  ;;  %v303_v31 = vand.u32 4294901760, %v4794_v11  ;;  %v313_v34 = vand.u32 4294901760, %v4797_v12  ;;  %v175_v35 = vsel %vm143_vm0, %v41_v6, 0  ;;  %v178_v36 = vsel %vm143_vm0, %v42_v7, 0 }
  0x12   :  { %3866 = vmatpush3.msra.mxu1 %v464_v49  ;;  %v4813_v15 = vsub.f32 %v163_v63, %v4800_v13  ;;  %v4816_v37 = vsub.f32 %v166_v0, %v4802_v14  ;;  %3895 = vmatprep.subr.mxu0 %v4682_v18  ;;  %v4820_v40 = vsub.f32 %v169_v1, %v4804_v20  ;;  %v4822_v41 = vand.u32 4294901760, %v175_v35 }
  0x13   :  { %3867 = vmatprep.subr.mxu1 %v471_v52  ;;  %v304_v42 = vsub.f32 %v4794_v11, %v303_v31  ;;  %v314_v43 = vsub.f32 %v4797_v12, %v313_v34  ;;  %v4831_v44 = vsub.f32 %v172_v2, %v4806_v21  ;;  %v4833_v45 = vand.u32 4294901760, %v178_v36 }
  0x14   :  { %3841 = vmatmul.mubr.f32.gmra.mxu0 %v295_v9  ;;  %3868 = vmatpush3.msra.mxu1 %v471_v52  ;;  %v323_v46 = vand.u32 4294901760, %v4813_v15  ;;  %v333_v47 = vand.u32 4294901760, %v4816_v37  ;;  %v343_v48 = vand.u32 4294901760, %v4820_v40  ;;  %v4841_v49 = vsub.f32 %v175_v35, %v4822_v41  ;;  %v43_v52 = vld [vmem:[%s6421_s1 + $0x60] sm:$0xff] }
  0x15   :  { %3870 = vmatmul.mubr.f32.vlgmr.msra.gmra.mxu1 %v4679_v17  ;;  %3925 = vmatprep.subr.mxu1 %v4648_v3  ;;  %v305_v54 = vand.u32 4294901760, %v304_v42  ;;  %v315_v55 = vand.u32 4294901760, %v314_v43  ;;  %v353_v56 = vand.u32 4294901760, %v4831_v44  ;;  %v4853_v57 = vsub.f32 %v178_v36, %v4833_v45 }
  0x16   :  { %3926 = vmatpush3.msra.mxu1 %v4648_v3  ;;  %3872 = vmatprep.mubr.f32.mxu1 %v4711_v28 }
  0x17   :  { %12 = vsyncpa [#allocation3], 0  ;;  %v324_v58 = vsub.f32 %v4813_v15, %v323_v46  ;;  %v334_v59 = vsub.f32 %v4816_v37, %v333_v47  ;;  %3896 = vmatpush3.msra.mxu0 %v4682_v18  ;;  %3927 = vmatprep.subr.mxu1 %v4650_v4  ;;  %v344_v60 = vsub.f32 %v4820_v40, %v343_v48  ;;  %v363_v63 = vand.u32 4294901760, %v4841_v49  ;;  %v45_v2 = vld [vmem:[%s6421_s1 + $0x70] sm:$0xff]  ;;  %v46_v18 = vld [vmem:[%s6421_s1 + $0x78] sm:$0xff] }
  0x18   :  { %3843 = vmatprep.mubr.f32.mxu0 %v305_v54  ;;  %3928 = vmatpush3.msra.mxu1 %v4650_v4  ;;  %v181_v0 = vsel %vm143_vm0, %v43_v52, 0  ;;  %v184_v1 = vsel %vm143_vm0, %v44_v53, 0  ;;  %v354_v8 = vsub.f32 %v4831_v44, %v353_v56  ;;  %v373_v9 = vand.u32 4294901760, %v4853_v57 }
  0x19   :  { %3844 = vmatmul.mubr.f32.gmra.mxu0 %v315_v55  ;;  %3873 = vmatmul.mubr.f32.gmra.mxu1 %v4713_v29  ;;  %v325_v6 = vand.u32 4294901760, %v324_v58  ;;  %v335_v7 = vand.u32 4294901760, %v334_v59  ;;  %v345_v35 = vand.u32 4294901760, %v344_v60  ;;  %v364_v36 = vsub.f32 %v4841_v49, %v363_v63 }
  0x1a   :  { %3875 = vmatprep.mubr.f32.mxu1 %v4779_v61  ;;  %3897 = vmatprep.subr.mxu0 %v4686_v19  ;;  %v4886_v42 = vand.u32 4294901760, %v181_v0  ;;  %v4888_v43 = vand.u32 4294901760, %v184_v1  ;;  %v187_v52 = vsel %vm143_vm0, %v45_v2, 0  ;;  %v190_v53 = vsel %vm143_vm0, %v46_v18, 0 }
  0x1b   :  { %3846 = vmatprep.mubr.f32.mxu0 %v325_v6  ;;  %3898 = vmatpush3.msra.mxu0 %v4686_v19  ;;  %v4900_v58 = vand.u32 4294901760, %v187_v52  ;;  %v355_v19 = vand.u32 4294901760, %v354_v8  ;;  %v374_v59 = vsub.f32 %v4853_v57, %v373_v9  ;;  %v4907_v60 = vand.u32 4294901760, %v190_v53 }
  0x1c   :  { %3929 = vmatprep.subr.mxu1 %v4652_v5  ;;  %v4895_v54 = vsub.f32 %v181_v0, %v4886_v42  ;;  %v4898_v55 = vsub.f32 %v184_v1, %v4888_v43  ;;  %3899 = vmatprep.subr.mxu0 %v4691_v22  ;;  %v365_v0 = vand.u32 4294901760, %v364_v36  ;;  %vm4597_vm1 = vmmov 0  }
  0x1d   :  { %3847 = vmatmul.mubr.f32.gmra.mxu0 %v335_v7  ;;  %3876 = vmatmul.mubr.f32.gmra.mxu1 %v4781_v62  ;;  %v4913_v18 = vsub.f32 %v187_v52, %v4900_v58  ;;  %v4917_v6 = vsub.f32 %v190_v53, %v4907_v60  ;;  %v375_v36 = vand.u32 4294901760, %v374_v59  ;;  %v59_v53 = vld [vmem:[%s6422_s2 + $0x60] sm:$0xff]  ;;  %v58_v59 = vld [vmem:[%s6422_s2 + $0x58] sm:$0xff] }
  0x1e   :  { %3849 = vmatprep.mubr.f32.mxu0 %v345_v35  ;;  %3878 = vmatprep.mubr.f32.mxu1 %v4800_v13  ;;  %v6428_v1 = vand.u32 4294901760, %v4895_v54  ;;  %v393_v2 = vand.u32 4294901760, %v4898_v55  ;;  %v61_v35 = vld [vmem:[%s6422_s2 + $0x70] sm:$0xff] }
  0x1f   :  { %3930 = vmatpush3.msra.mxu1 %v4652_v5  ;;  %3900 = vmatpush3.msra.mxu0 %v4691_v22  ;;  %v6429_v8 = vand.u32 4294901760, %v4913_v18  ;;  %v413_v52 = vand.u32 4294901760, %v4917_v6 }
  0x20   :  { %v384_v7 = vsub.f32 %v4895_v54, %v6428_v1  ;;  %3931 = vmatprep.subr.mxu1 %v4663_v10  ;;  %3957 = vmatprep.subr.mxu0 %v4695_v23  ;;  %v394_v22 = vsub.f32 %v4898_v55, %v393_v2 }
  0x21   :  { %3850 = vmatmul.mubr.f32.gmra.mxu0 %v355_v19  ;;  %3879 = vmatmul.mubr.f32.gmra.mxu1 %v4802_v14  ;;  %v404_v19 = vsub.f32 %v4913_v18, %v6429_v8  ;;  %v57_v8 = vld [vmem:[%s6422_s2 + $0x50] sm:$0xff] }
  0x22   :  { %3852 = vmatprep.mubr.f32.mxu0 %v365_v0  ;;  %3881 = vmatprep.mubr.f32.mxu1 %v4804_v20  ;;  %v385_v1 = vand.u32 4294901760, %v384_v7  ;;  %v395_v0 = vand.u32 4294901760, %v394_v22  ;;  %v414_v7 = vsub.f32 %v4917_v6, %v413_v52 }
  0x23   :  { %3932 = vmatpush3.msra.mxu1 %v4663_v10  ;;  %135 = vperm.xlu0 %4571, %v61_v35   ;;  %v405_v35 = vand.u32 4294901760, %v404_v19  ;;  %v52_v19 = vld [vmem:[%s6422_s2 + $0x28] sm:$0xff] }
  0x24   :  { %3989 = vmatprep.subr.mxu1 %v4648_v3  ;;  %125 = vperm.xlu1 %4572, %v59_v53   ;;  %v415_v22 = vand.u32 4294901760, %v414_v7  ;;  %v55_v53 = vld [vmem:[%s6422_s2 + $0x40] sm:$0xff] }
  0x25   :  { %3853 = vmatmul.mubr.f32.gmra.mxu0 %v375_v36  ;;  %3882 = vmatmul.mubr.f32.gmra.mxu1 %v4806_v21  ;;  %v56_v36 = vld [vmem:[%s6422_s2 + $0x48] sm:$0xff] }
  0x26   :  { %3855 = vmatprep.mubr.f32.mxu0 %v385_v1  ;;  %3884 = vmatprep.mubr.f32.mxu1 %v4822_v41  ;;  %v54_v1 = vld [vmem:[%s6422_s2 + $0x38] sm:$0xff] }
  0x27   :  { %120 = vperm.xlu0 %4571, %v58_v59   ;;  %v51_v59 = vld [vmem:[%s6422_s2 + $0x20] sm:$0xff] }
  0x28   :  { %115 = vperm.xlu1 %4572, %v57_v8   ;;  %v53_v8 = vld [vmem:[%s6422_s2 + $0x30] sm:$0xff] }
  0x29   :  { %3856 = vmatmul.mubr.f32.gmra.mxu0 %v395_v0  ;;  %3885 = vmatmul.mubr.f32.gmra.mxu1 %v4833_v45 }
  0x2a   :  { %3858 = vmatprep.mubr.f32.mxu0 %v405_v35  ;;  %3887 = vmatprep.mubr.f32.mxu1 %v4886_v42 }
  0x2b   :  { %110 = vperm.xlu0 %4571, %v56_v36  }
  0x2c   :  { %105 = vperm.xlu1 %4572, %v55_v53  }
  0x2d   :  { %3859 = vmatmul.mubr.f32.gmra.mxu0 %v415_v22  ;;  %3888 = vmatmul.mubr.f32.gmra.mxu1 %v4888_v43 }
  0x2e   :  { %3901 = vmatprep.mubr.f32.mxu0 %v4698_v24  ;;  %3890 = vmatprep.mubr.f32.mxu1 %v4900_v58  ;;  %v1369_v24 = vld [vmem:[%s6424_s4 + $0x78] sm:$0xff] }
  0x2f   :  { %100 = vperm.xlu0 %4571, %v54_v1  }
  0x30   :  { %95 = vperm.xlu1 %4572, %v53_v8  }
  0x31   :  { %3902 = vmatmul.mubr.f32.vlgmr.msra.gmra.mxu0 %v4701_v25  ;;  %3891 = vmatmul.mubr.f32.gmra.mxu1 %v4907_v60  ;;  %v1367_v25 = vld [vmem:[%s6424_s4 + $0x68] sm:$0xff] }
  0x32   :  { %3904 = vmatprep.mubr.f32.mxu0 %v4735_v38  ;;  %3933 = vmatprep.mubr.f32.mxu1 %v263_v32  ;;  %v6473_v32 = vand.u32 4294901760, %v4913_v18  ;;  %v1363_v38 = vld [vmem:[%s6424_s4 + $0x48] sm:$0xff] }
  0x33   :  { %3958 = vmatpush3.msra.mxu0 %v4695_v23  ;;  %90 = vperm.xlu0 %4571, %v52_v19   ;;  %v48_v23 = vld [vmem:[%s6422_s2 + $0x8] sm:$0xff] }
  0x34   :  { %3959 = vmatprep.subr.mxu0 %v4704_v26  ;;  %85 = vperm.xlu1 %4572, %v51_v59  }
  0x35   :  { %3905 = vmatmul.mubr.f32.gmra.mxu0 %v4738_v39  ;;  %3934 = vmatmul.mubr.f32.vlgmr.msra.gmra.mxu1 %v273_v33  ;;  %v1364_v33 = vld [vmem:[%s6424_s4 + $0x50] sm:$0xff]  ;;  %v1362_v39 = vld [vmem:[%s6424_s4 + $0x40] sm:$0xff] }
  0x36   :  { %3907 = vmatprep.mubr.f32.mxu0 %v4794_v11  ;;  %3990 = vmatpush3.msra.mxu1 %v4648_v3  ;;  %v50_v3 = vld [vmem:[%s6422_s2 + $0x18] sm:$0xff]  ;;  %v2753_v11 = vld [vmem:[%s6426_s6] sm:$0xff] }
  0x37   :  { %3936 = vmatprep.mubr.f32.mxu1 %v283_v50  ;;  %3960 = vmatpush3.msra.mxu0 %v4704_v26  ;;  %v6472_v26 = vand.u32 4294901760, %v4895_v54  ;;  %v1361_v50 = vld [vmem:[%s6424_s4 + $0x38] sm:$0xff] }
  0x38   :  { %3991 = vmatprep.subr.mxu1 %v4650_v4  ;;  %3961 = vmatprep.subr.mxu0 %v4709_v27 }
  0x39   :  { %3908 = vmatmul.mubr.f32.gmra.mxu0 %v4797_v12  ;;  %3937 = vmatmul.mubr.f32.gmra.mxu1 %v293_v51  ;;  %v1356_v51 = vld [vmem:[%s6424_s4 + $0x10] sm:$0xff] }
  0x3a   :  { %3910 = vmatprep.mubr.f32.mxu0 %v4813_v15  ;;  %3939 = vmatprep.mubr.f32.mxu1 %v303_v31 }
  0x3b   :  { %3992 = vmatpush3.msra.mxu1 %v4650_v4  ;;  %3962 = vmatpush3.msra.mxu0 %v4709_v27  ;;  %v49_v4 = vld [vmem:[%s6422_s2 + $0x10] sm:$0xff]  ;;  %v1366_v27 = vld [vmem:[%s6424_s4 + $0x60] sm:$0xff] }
  0x3c   :  { %3993 = vmatprep.subr.mxu1 %v4652_v5  ;;  %3963 = vmatprep.subr.mxu0 %v4716_v30 }
  0x3d   :  { %3911 = vmatmul.mubr.f32.gmra.mxu0 %v4816_v37  ;;  %3940 = vmatmul.mubr.f32.gmra.mxu1 %v313_v34 }
  0x3e   :  { %3913 = vmatprep.mubr.f32.mxu0 %v4820_v40  ;;  %3942 = vmatprep.mubr.f32.mxu1 %v323_v46 }
  0x3f   :  { %3994 = vmatpush3.msra.mxu1 %v4652_v5  ;;  %3964 = vmatpush3.msra.mxu0 %v4716_v30  ;;  %v47_v5 = vld [vmem:[%s6422_s2] sm:$0xff]  ;;  %v1365_v30 = vld [vmem:[%s6424_s4 + $0x58] sm:$0xff] }
  0x40   :  { %3995 = vmatprep.subr.mxu1 %v4663_v10  ;;  %80 = vperm.xlu0 %4571, %v50_v3  }
  0x41   :  { %3914 = vmatmul.mubr.f32.gmra.mxu0 %v4831_v44  ;;  %3943 = vmatmul.mubr.f32.gmra.mxu1 %v333_v47  ;;  %v1338_v47 = vld [vmem:[%s6423_s3] sm:$0xff] }
  0x42   :  { %3916 = vmatprep.mubr.f32.mxu0 %v4841_v49  ;;  %3945 = vmatprep.mubr.f32.mxu1 %v343_v48  ;;  %v5147_v49 = vand.u32 4294901760, %v1338_v47 }
  0x43   :  { %3996 = vmatpush3.msra.mxu1 %v4663_v10  ;;  %75 = vperm.xlu1 %4572, %v49_v4   ;;  %v1368_v10 = vld [vmem:[%s6424_s4 + $0x70] sm:$0xff] }
  0x44   :  { %70 = vperm.xlu0 %4571, %v48_v23   ;;  %6474 = vst [vmem:[#allocation5_spill] sm:$0xff] %v5147_v49 }
  0x45   :  { %3917 = vmatmul.mubr.f32.gmra.mxu0 %v4853_v57  ;;  %3946 = vmatmul.mubr.f32.gmra.mxu1 %v353_v56  ;;  %v5150_v57 = vsub.f32 %v1338_v47, %v5147_v49 }
  0x46   :  { %3919 = vmatprep.mubr.f32.mxu0 %v4895_v54  ;;  %3948 = vmatprep.mubr.f32.mxu1 %v363_v63 }
  0x47   :  { %65 = vperm.xlu1 %4572, %v47_v5   ;;  %6475 = vst [vmem:[#allocation6_spill] sm:$0xff] %v5150_v57 }
  0x48   :  { %1447 = vperm.xlu0 %4571, %v1369_v24  }
  0x49   :  { %3920 = vmatmul.mubr.f32.gmra.mxu0 %v4898_v55  ;;  %3949 = vmatmul.mubr.f32.gmra.mxu1 %v373_v9 }
  0x4a   :  { %3922 = vmatprep.mubr.f32.mxu0 %v4913_v18  ;;  %3951 = vmatprep.mubr.f32.mxu1 %v6472_v26 }
  0x4b   :  { %1442 = vperm.xlu1 %4572, %v1368_v10  }
  0x4c   :  { %1437 = vperm.xlu0 %4571, %v1367_v25  }
  0x4d   :  { %3923 = vmatmul.mubr.f32.gmra.mxu0 %v4917_v6  ;;  %3952 = vmatmul.mubr.f32.gmra.mxu1 %v393_v2 }
  0x4e   :  { %3965 = vmatprep.mubr.f32.mxu0 %v4677_v16  ;;  %3954 = vmatprep.mubr.f32.mxu1 %v6473_v32 }
  0x4f   :  { %1432 = vperm.xlu1 %4572, %v1366_v27  }
  0x50   :  { %1427 = vperm.xlu0 %4571, %v1365_v30  }
  0x51   :  { %3966 = vmatmul.mubr.f32.vlgmr.msra.gmra.mxu0 %v4679_v17  ;;  %3955 = vmatmul.mubr.f32.gmra.mxu1 %v413_v52 }
  0x52   :  { %3968 = vmatprep.mubr.f32.mxu0 %v4711_v28  ;;  %3997 = vmatprep.mubr.f32.mxu1 %v4677_v16  ;;  %v1360_v16 = vld [vmem:[%s6424_s4 + $0x30] sm:$0xff] }
  0x53   :  { %1422 = vperm.xlu1 %4572, %v1364_v33  }
  0x54   :  { %1417 = vperm.xlu0 %4571, %v1363_v38  }
  0x55   :  { %3969 = vmatmul.mubr.f32.gmra.mxu0 %v4713_v29  ;;  %3998 = vmatmul.mubr.f32.vlgmr.msra.gmra.mxu1 %v4679_v17  ;;  %v1359_v17 = vld [vmem:[%s6424_s4 + $0x28] sm:$0xff] }
  0x56   :  { %3971 = vmatprep.mubr.f32.mxu0 %v4779_v61  ;;  %4000 = vmatprep.mubr.f32.mxu1 %v4711_v28  ;;  %v1358_v28 = vld [vmem:[%s6424_s4 + $0x20] sm:$0xff] }
  0x57   :  { %1412 = vperm.xlu1 %4572, %v1362_v39  }
  0x58   :  { %1407 = vperm.xlu0 %4571, %v1361_v50  }
  0x59   :  { %3972 = vmatmul.mubr.f32.gmra.mxu0 %v4781_v62  ;;  %4001 = vmatmul.mubr.f32.gmra.mxu1 %v4713_v29  ;;  %v1357_v29 = vld [vmem:[%s6424_s4 + $0x18] sm:$0xff] }
  0x5a   :  { %3974 = vmatprep.mubr.f32.mxu0 %v4800_v13  ;;  %4003 = vmatprep.mubr.f32.mxu1 %v4779_v61  ;;  %v1355_v61 = vld [vmem:[%s6424_s4 + $0x8] sm:$0xff] }
  0x5b   :  { %1402 = vperm.xlu1 %4572, %v1360_v16  }
  0x5c   :  { %1397 = vperm.xlu0 %4571, %v1359_v17  }
  0x5d   :  { %3975 = vmatmul.mubr.f32.gmra.mxu0 %v4802_v14  ;;  %4004 = vmatmul.mubr.f32.gmra.mxu1 %v4781_v62  ;;  %v1354_v62 = vld [vmem:[%s6424_s4] sm:$0xff] }
  0x5e   :  { %3977 = vmatprep.mubr.f32.mxu0 %v4804_v20  ;;  %4006 = vmatprep.mubr.f32.mxu1 %v4800_v13 }
  0x5f   :  { %1392 = vperm.xlu1 %4572, %v1358_v28  }
  0x60   :  { %1387 = vperm.xlu0 %4571, %v1357_v29  }
  0x61   :  { %3978 = vmatmul.mubr.f32.gmra.mxu0 %v4806_v21  ;;  %4007 = vmatmul.mubr.f32.gmra.mxu1 %v4802_v14 }
  0x62   :  { %3980 = vmatprep.mubr.f32.mxu0 %v4822_v41  ;;  %4009 = vmatprep.mubr.f32.mxu1 %v4804_v20 }
  0x63   :  { %1382 = vperm.xlu1 %4572, %v1356_v51  }
  0x64   :  { %1377 = vperm.xlu0 %4571, %v1355_v61  }
  0x65   :  { %3981 = vmatmul.mubr.f32.gmra.mxu0 %v4833_v45  ;;  %4010 = vmatmul.mubr.f32.gmra.mxu1 %v4806_v21 }
  0x66   :  { %3983 = vmatprep.mubr.f32.mxu0 %v4886_v42  ;;  %4012 = vmatprep.mubr.f32.mxu1 %v4822_v41 }
  0x67   :  { %1372 = vperm.xlu1 %4572, %v1354_v62  }
  0x68   :  { %2756 = vperm.xlu0 %4571, %v2753_v11  }
  0x69   :  { %3984 = vmatmul.mubr.f32.gmra.mxu0 %v4888_v43  ;;  %4013 = vmatmul.mubr.f32.gmra.mxu1 %v4833_v45 }
  0x6a   :  { %3986 = vmatprep.mubr.f32.mxu0 %v4900_v58  ;;  %4015 = vmatprep.mubr.f32.mxu1 %v4886_v42 }
  0x6d   :  { %3987 = vmatmul.mubr.f32.gmra.mxu0 %v4907_v60  ;;  %4016 = vmatmul.mubr.f32.gmra.mxu1 %v4888_v43  ;;  %v6430_v43 = vand.u32 4294901760, %v5150_v57 }
  0x6e   :  { %4018 = vmatprep.mubr.f32.mxu1 %v4900_v58 }
  0x6f   :  { %v1534_v58 = vsub.f32 %v5150_v57, %v6430_v43 }
  0x71   :  { %4019 = vmatmul.mubr.f32.gmra.mxu1 %v4907_v60  ;;  %v1535_v0 = vand.u32 4294901760, %v1534_v58 }
  0x72   :  { %4109 = vmatprep.mubr.f32.mxu1 %v5147_v49 }
  0x73   :  { %4053 = vmatprep.mubr.f32.mxu0 %v1535_v0 }
  0x7f   :  { %v5136_v13 = vpop.permute.xlu1 %130 }
  0x80   :  { %v5134_v12 = vpop.permute.xlu0 %140 }
  0x9e   :  { %v5138_v14 = vpop.permute.xlu0 %135 }
  0x9f   :  { %v5140_v20 = vpop.permute.xlu1 %125 }
  0xa2   :  { %v121_v21 = vpop.permute.xlu0 %120 }
  0xa3   :  { %v5142_v31 = vpop.permute.xlu1 %115 }
  0xa6   :  { %v111_v34 = vpop.permute.xlu0 %110 }
  0xa7   :  { %v106_v15 = vpop.permute.xlu1 %105 }
  0xaa   :  { %v101_v37 = vpop.permute.xlu0 %100 }
  0xab   :  { %v96_v40 = vpop.permute.xlu1 %95 }
  0xae   :  { %v91_v41 = vpop.permute.xlu0 %90 }
  0xaf   :  { %v86_v44 = vpop.permute.xlu1 %85 }
  0xbb   :  { %v81_v45 = vpop.permute.xlu0 %80 }
  0xbe   :  { %v76_v46 = vpop.permute.xlu1 %75 }
  0xbf   :  { %v71_v48 = vpop.permute.xlu0 %70 }
  0xc2   :  { %v66_v42 = vpop.permute.xlu1 %65 }
  0xd0   :  { %v3839_v56 = vpop.f32.mrf.mxu0 }
  0xd1   :  { %v278_v9 = vadd.f32 %v3839_v56, %v71_v48 }
  0xd2   :  { %v267_v63 = vpop.f32.mrf.mxu0 }
  0xd3   :  { %v268_v60 = vadd.f32 %v267_v63, %v66_v42 }
  0xd4   :  { %v3842_v54 = vpop.f32.mrf.mxu0 }
  0xd5   :  { %v3871_v55 = vpop.f32.mrf.mxu1  ;;  %v298_v2 = vadd.f32 %v3842_v54, %v81_v45 }
  0xd6   :  { %v287_v18 = vpop.f32.mrf.mxu0  ;;  %v515_v6 = vadd.f32 %v3871_v55, %v278_v9 }
  0xd7   :  { %v508_v52 = vpop.f32.mrf.mxu1  ;;  %v288_v22 = vadd.f32 %v287_v18, %v76_v46 }
  0xd8   :  { %v509_v7 = vadd.f32 %v508_v52, %v268_v60 }
  0xd9   :  { %v3845_v35 = vpop.f32.mrf.mxu0  ;;  %v3874_v36 = vpop.f32.mrf.mxu1 }
  0xda   :  { %v318_v53 = vadd.f32 %v3845_v35, %v91_v41  ;;  %v527_v1 = vadd.f32 %v3874_v36, %v298_v2 }
  0xdb   :  { %v307_v8 = vpop.f32.mrf.mxu0  ;;  %v520_v19 = vpop.f32.mrf.mxu1 }
  0xdc   :  { %v521_v59 = vadd.f32 %v520_v19, %v288_v22  ;;  %v308_v23 = vadd.f32 %v307_v8, %v86_v44 }
  0xdd   :  { %v3848_v3 = vpop.f32.mrf.mxu0  ;;  %v3877_v4 = vpop.f32.mrf.mxu1 }
  0xde   :  { %v338_v5 = vadd.f32 %v3848_v3, %v101_v37  ;;  %v539_v24 = vadd.f32 %v3877_v4, %v318_v53 }
  0xdf   :  { %v327_v10 = vpop.f32.mrf.mxu0  ;;  %v532_v25 = vpop.f32.mrf.mxu1 }
  0xe0   :  { %v533_v26 = vadd.f32 %v532_v25, %v308_v23  ;;  %v328_v32 = vadd.f32 %v327_v10, %v96_v40 }
  0xe1   :  { %v3851_v27 = vpop.f32.mrf.mxu0  ;;  %v3880_v30 = vpop.f32.mrf.mxu1 }
  0xe2   :  { %v358_v33 = vadd.f32 %v3851_v27, %v111_v34  ;;  %v5157_v38 = vadd.f32 %v3880_v30, %v338_v5 }
  0xe3   :  { %v347_v39 = vpop.f32.mrf.mxu0  ;;  %v544_v50 = vpop.f32.mrf.mxu1 }
  0xe4   :  { %v5159_v16 = vadd.f32 %v544_v50, %v328_v32  ;;  %v348_v29 = vadd.f32 %v347_v39, %v106_v15 }
  0xe5   :  { %v3854_v17 = vpop.f32.mrf.mxu0  ;;  %v3883_v28 = vpop.f32.mrf.mxu1 }
  0xe6   :  { %v378_v51 = vadd.f32 %v3854_v17, %v121_v21  ;;  %v5161_v61 = vadd.f32 %v3883_v28, %v358_v33 }
  0xe7   :  { %v367_v62 = vpop.f32.mrf.mxu0  ;;  %v556_v11 = vpop.f32.mrf.mxu1 }
  0xe8   :  { %v5163_v37 = vadd.f32 %v556_v11, %v348_v29  ;;  %v368_v34 = vadd.f32 %v367_v62, %v5142_v31 }
  0xe9   :  { %v3857_v41 = vpop.f32.mrf.mxu0  ;;  %v3886_v44 = vpop.f32.mrf.mxu1 }
  0xea   :  { %v398_v40 = vadd.f32 %v3857_v41, %v5136_v13  ;;  %v5167_v45 = vadd.f32 %v3886_v44, %v378_v51 }
  0xeb   :  { %v387_v46 = vpop.f32.mrf.mxu0  ;;  %v568_v47 = vpop.f32.mrf.mxu1 }
  0xec   :  { %v5169_v48 = vadd.f32 %v568_v47, %v368_v34  ;;  %v388_v56 = vadd.f32 %v387_v46, %v5140_v20 }
  0xed   :  { %v5171_v15 = vpop.f32.mrf.mxu0  ;;  %v3889_v21 = vpop.f32.mrf.mxu1 }
  0xee   :  { %v5174_v63 = vadd.f32 %v3889_v21, %v398_v40 }
  0xef   :  { %v5176_v9 = vpop.f32.mrf.mxu0  ;;  %v580_v42 = vpop.f32.mrf.mxu1 }
  0xf0   :  { %v5178_v54 = vadd.f32 %v580_v42, %v388_v56 }
  0xf1   :  { %v3903_v31 = vpop.f32.mrf.mxu0  ;;  %v5180_v13 = vpop.f32.mrf.mxu1 }
  0xf2   :  { %v686_v55 = vadd.f32 %v3903_v31, %v515_v6 }
  0xf3   :  { %v678_v58 = vpop.f32.mrf.mxu0  ;;  %v5182_v60 = vpop.f32.mrf.mxu1 }
  0xf4   :  { %v679_v2 = vadd.f32 %v678_v58, %v509_v7 }
  0xf5   :  { %v3906_v18 = vpop.f32.mrf.mxu0  ;;  %v3935_v52 = vpop.f32.mrf.mxu1 }
  0xf6   :  { %v700_v0 = vadd.f32 %v3906_v18, %v527_v1  ;;  %v5184_v35 = vadd.f32 %v3935_v52, %v686_v55 }
  0xf7   :  { %v692_v20 = vpop.f32.mrf.mxu0  ;;  %v860_v36 = vpop.f32.mrf.mxu1 }
  0xf8   :  { %6476 = vst [vmem:[#allocation7_spill] sm:$0xff] %v5184_v35  ;;  %v693_v22 = vadd.f32 %v692_v20, %v521_v59  ;;  %v5186_v53 = vadd.f32 %v860_v36, %v679_v2 }
  0xf9   :  { %v3909_v8 = vpop.f32.mrf.mxu0  ;;  %v3938_v19 = vpop.f32.mrf.mxu1 }
  0xfa   :  { %6477 = vst [vmem:[#allocation8_spill] sm:$0xff] %v5186_v53  ;;  %v714_v3 = vadd.f32 %v3909_v8, %v539_v24  ;;  %v5188_v4 = vadd.f32 %v3938_v19, %v700_v0 }
  0xfb   :  { %v706_v6 = vpop.f32.mrf.mxu0  ;;  %v876_v23 = vpop.f32.mrf.mxu1 }
  0xfc   :  { %v707_v5 = vadd.f32 %v706_v6, %v533_v26  ;;  %v5190_v10 = vadd.f32 %v876_v23, %v693_v22 }
  0xfd   :  { %v3912_v7 = vpop.f32.mrf.mxu0  ;;  %v3941_v25 = vpop.f32.mrf.mxu1 }
  0xfe   :  { %v5192_v1 = vadd.f32 %v3941_v25, %v714_v3 }
  0xff   :  { %v5194_v27 = vpop.f32.mrf.mxu0  ;;  %v892_v30 = vpop.f32.mrf.mxu1 }
 0x100   :  { %v5196_v59 = vadd.f32 %v892_v30, %v707_v5  ;;  %v418_v30 = vadd.f32 %v5171_v15, %v5134_v12 }
 0x101   :  { %v3915_v32 = vpop.f32.mrf.mxu0  ;;  %v5198_v33 = vpop.f32.mrf.mxu1 }
 0x102   :  { %v599_v35 = vadd.f32 %v5180_v13, %v418_v30  ;;  %v742_v15 = vadd.f32 %v3915_v32, %v5161_v61  ;;  %v721_v61 = vadd.f32 %v5194_v27, %v5159_v16 }
 0x103   :  { %v734_v24 = vpop.f32.mrf.mxu0  ;;  %v5200_v39 = vpop.f32.mrf.mxu1 }
 0x104   :  { %v735_v13 = vadd.f32 %v734_v24, %v5163_v37 }
 0x105   :  { %v3918_v50 = vpop.f32.mrf.mxu0  ;;  %v3947_v17 = vpop.f32.mrf.mxu1 }
 0x106   :  { %v756_v43 = vadd.f32 %v3918_v50, %v5167_v45  ;;  %v728_v45 = vadd.f32 %v3912_v7, %v5157_v38  ;;  %v933_v30 = vadd.f32 %v3947_v17, %v742_v15 }
 0x107   :  { %v748_v26 = vpop.f32.mrf.mxu0  ;;  %v5202_v28 = vpop.f32.mrf.mxu1 }
 0x108   :  { %v925_v7 = vadd.f32 %v5202_v28, %v735_v13  ;;  %v909_v28 = vadd.f32 %v5200_v39, %v721_v61 }
 0x109   :  { %v3921_v29 = vpop.f32.mrf.mxu0  ;;  %v3950_v51 = vpop.f32.mrf.mxu1 }
 0x10b   :  { %v762_v62 = vpop.f32.mrf.mxu0  ;;  %v940_v11 = vpop.f32.mrf.mxu1 }
 0x10d   :  { %v3924_v41 = vpop.f32.mrf.mxu0  ;;  %v3953_v44 = vpop.f32.mrf.mxu1 }
 0x10f   :  { %v776_v34 = vpop.f32.mrf.mxu0  ;;  %v956_v40 = vpop.f32.mrf.mxu1 }
 0x111   :  { %v5204_v46 = vpop.f32.mrf.mxu0  ;;  %v3956_v47 = vpop.f32.mrf.mxu1 }
 0x112   :  { %6478 = vst [vmem:[#allocation9_spill] sm:$0xff] %v5204_v46 }
 0x113   :  { %v5206_v21 = vpop.f32.mrf.mxu0  ;;  %v972_v56 = vpop.f32.mrf.mxu1 }
 0x114   :  { %6479 = vst [vmem:[#allocation10_spill] sm:$0xff] %v5206_v21  ;;  %v949_v21 = vadd.f32 %v3950_v51, %v756_v43 }
 0x115   :  { %v5208_v42 = vpop.f32.mrf.mxu0  ;;  %v5210_v31 = vpop.f32.mrf.mxu1 }
 0x116   :  { %6480 = vst [vmem:[#allocation11_spill] sm:$0xff] %v5210_v31  ;;  %v408_v31 = vadd.f32 %v5176_v9, %v5138_v14  ;;  %v784_v14 = vadd.f32 %v3924_v41, %v599_v35 }
 0x117   :  { %v5212_v55 = vpop.f32.mrf.mxu0  ;;  %v5214_v58 = vpop.f32.mrf.mxu1 }
 0x118   :  { %6481 = vst [vmem:[#allocation12_spill] sm:$0xff] %v5214_v58  ;;  %v770_v58 = vadd.f32 %v3921_v29, %v5174_v63  ;;  %v593_v12 = vadd.f32 %v5182_v60, %v408_v31 }
 0x119   :  { %v5216_v2 = vpop.f32.mrf.mxu0  ;;  %v5218_v18 = vpop.f32.mrf.mxu1 }
 0x11a   :  { %6482 = vst [vmem:[#allocation13_spill] sm:$0xff] %v5218_v18  ;;  %v763_v18 = vadd.f32 %v762_v62, %v5178_v54 }
 0x11b   :  { %v5220_v52 = vpop.f32.mrf.mxu0  ;;  %v5222_v0 = vpop.f32.mrf.mxu1 }
 0x11c   :  { %6483 = vst [vmem:[#allocation14_spill] sm:$0xff] %v5222_v0  ;;  %v749_v0 = vadd.f32 %v748_v26, %v5169_v48  ;;  %v957_v9 = vadd.f32 %v956_v40, %v763_v18  ;;  %v777_v48 = vadd.f32 %v776_v34, %v593_v12  ;;  %v917_v34 = vadd.f32 %v5198_v33, %v728_v45 }
 0x11d   :  { %v5224_v20 = vpop.f32.mrf.mxu0  ;;  %v5226_v36 = vpop.f32.mrf.mxu1 }
 0x11e   :  { %v941_v43 = vadd.f32 %v940_v11, %v749_v0  ;;  %v973_v35 = vadd.f32 %v972_v56, %v777_v48  ;;  %v1106_v56 = vadd.f32 %v5224_v20, %v917_v34  ;;  %v1082_v20 = vadd.f32 %v5208_v42, %v5188_v4 }
 0x11f   :  { %v5228_v22 = vpop.f32.mrf.mxu0  ;;  %v5230_v8 = vpop.f32.mrf.mxu1  ;;  %v1088_v4 = vadd.f32 %v5220_v52, %v5196_v59  ;;  %v1076_v52 = vadd.f32 %v5212_v55, %v5190_v10 }
 0x120   :  { %6484 = vst [vmem:[#allocation15_spill] sm:$0xff] %v5230_v8  ;;  %v965_v8 = vadd.f32 %v3953_v44, %v770_v58  ;;  %v981_v44 = vadd.f32 %v3956_v47, %v784_v14 }
 0x121   :  { %v3979_v19 = vpop.f32.mrf.mxu0  ;;  %v5232_v3 = vpop.f32.mrf.mxu1  ;;  %v6488_v55 = vld [vmem:[#allocation13_spill] sm:$0xff] }
 0x122   :  { %v1118_v32 = vadd.f32 %v3979_v19, %v933_v30 }
 0x123   :  { %v1111_v6 = vpop.f32.mrf.mxu0  ;;  %v5234_v23 = vpop.f32.mrf.mxu1 }
 0x124   :  { %v1112_v40 = vadd.f32 %v1111_v6, %v925_v7  ;;  %v1100_v6 = vadd.f32 %v5228_v22, %v909_v28 }
 0x125   :  { %v3982_v5 = vpop.f32.mrf.mxu0  ;;  %v4011_v25 = vpop.f32.mrf.mxu1 }
 0x126   :  { %v1130_v63 = vadd.f32 %v3982_v5, %v949_v21  ;;  %v5275_v22 = vadd.f32 %v5234_v23, %v1100_v6 }
 0x127   :  { %v1123_v49 = vpop.f32.mrf.mxu0  ;;  %v1276_v57 = vpop.f32.mrf.mxu1 }
 0x128   :  { %v1124_v60 = vadd.f32 %v1123_v49, %v941_v43  ;;  %v1277_v18 = vadd.f32 %v1276_v57, %v1112_v40  ;;  %v1328_v30 = vmax.f32 %v5275_v22, 0.0 }
 0x129   :  { %v3985_v53 = vpop.f32.mrf.mxu0  ;;  %v4014_v46 = vpop.f32.mrf.mxu1 }
 0x12a   :  { %v1142_v51 = vadd.f32 %v3985_v53, %v965_v8  ;;  %v1295_v26 = vadd.f32 %v4014_v46, %v1130_v63  ;;  %v1283_v46 = vadd.f32 %v4011_v25, %v1118_v32  ;;  %v5261_v25 = vadd.f32 %v5232_v3, %v1106_v56 }
 0x12b   :  { %v1135_v50 = vpop.f32.mrf.mxu0  ;;  %v1288_v29 = vpop.f32.mrf.mxu1  ;;  %v1094_v63 = vadd.f32 %v5216_v2, %v5192_v1  ;;  %v1330_v3 = vmax.f32 %v1277_v18, 0.0 }
 0x12c   :  { %v1136_v31 = vadd.f32 %v1135_v50, %v957_v9  ;;  %v1289_v37 = vadd.f32 %v1288_v29, %v1124_v60  ;;  %v1333_v49 = vmax.f32 %v1295_v26, 0.0  ;;  %v1331_v12 = vmax.f32 %v1283_v46, 0.0 }
 0x12d   :  { %v3988_v54 = vpop.f32.mrf.mxu0  ;;  %v4017_v62 = vpop.f32.mrf.mxu1  ;;  %v5291_v1 = vadd.f32 %v5226_v36, %v1094_v63  ;;  %v1329_v42 = vmax.f32 %v5261_v25, 0.0  ;;  %v6486_v36 = vld [vmem:[#allocation15_spill] sm:$0xff]  ;;  %v5316_v48 = vand.u32 4294901760, %v1330_v3 }
 0x12e   :  { %v1307_v38 = vadd.f32 %v4017_v62, %v1142_v51  ;;  %v1154_v41 = vadd.f32 %v3988_v54, %v981_v44  ;;  %v1332_v8 = vmax.f32 %v1289_v37, 0.0  ;;  %v5263_v45 = vand.u32 4294901760, %v1333_v49  ;;  %v6497_v25 = vld [vmem:[#allocation11_spill] sm:$0xff] }
 0x12f   :  { %v1147_v11 = vpop.f32.mrf.mxu0  ;;  %v1300_v53 = vpop.f32.mrf.mxu1  ;;  %v5294_v2 = vand.u32 4294901760, %v1331_v12  ;;  %v5313_v13 = vadd.f32 %v6486_v36, %v1088_v4  ;;  %v5332_v44 = vadd.f32 %v6488_v55, %v1082_v20  ;;  %v1327_v60 = vmax.f32 %v5291_v1, 0.0  ;;  %v1340_v1 = vld [vmem:[%s6423_s3 + $0x10] sm:$0xff] }
 0x130   :  { %v1335_v24 = vmax.f32 %v1307_v38, 0.0  ;;  %v1301_v17 = vadd.f32 %v1300_v53, %v1136_v31  ;;  %v1148_v21 = vadd.f32 %v1147_v11, %v973_v35  ;;  %v5277_v50 = vand.u32 4294901760, %v1332_v8  ;;  %v1339_v11 = vld [vmem:[%s6423_s3 + $0x8] sm:$0xff]  ;;  %v6490_v53 = vld [vmem:[#allocation14_spill] sm:$0xff] }
 0x131   :  { %v4020_v47 = vpop.f32.mrf.mxu1  ;;  %v5298_v23 = vsub.f32 %v1333_v49, %v5263_v45  ;;  %v5335_v31 = vand.u32 4294901760, %v1329_v42  ;;  %v5338_v38 = vsub.f32 %v1331_v12, %v5294_v2  ;;  %v1326_v37 = vmax.f32 %v5313_v13, 0.0  ;;  %v6492_v49 = vld [vmem:[#allocation7_spill] sm:$0xff] }
 0x132   :  { %v5253_v58 = vand.u32 4294901760, %v1335_v24  ;;  %v1334_v16 = vmax.f32 %v1301_v17, 0.0  ;;  %v1319_v27 = vadd.f32 %v4020_v47, %v1154_v41  ;;  %v5320_v26 = vsub.f32 %v1332_v8, %v5277_v50  ;;  %v6493_v47 = vld [vmem:[#allocation9_spill] sm:$0xff] }
 0x133   :  { %v1312_v0 = vpop.f32.mrf.mxu1  ;;  %v5347_v32 = vand.u32 4294901760, %v5298_v23  ;;  %v5353_v41 = vadd.f32 %v6490_v53, %v1076_v52  ;;  %v5360_v17 = vsub.f32 %v1330_v3, %v5316_v48  ;;  %v5374_v28 = vand.u32 4294901760, %v1339_v11 }
 0x134   :  { %v5257_v19 = vand.u32 4294901760, %v1334_v16  ;;  %v1337_v5 = vmax.f32 %v1319_v27, 0.0  ;;  %v1313_v33 = vadd.f32 %v1312_v0, %v1148_v21  ;;  %v5266_v15 = vsub.f32 %v1335_v24, %v5253_v58 }
 0x135   :  { %6489 = vst [vmem:[#allocation13_spill] sm:$0xff] %v5347_v32  ;;  %v5356_v24 = vand.u32 4294901760, %v1328_v30  ;;  %v5366_v46 = vand.u32 4294901760, %v5320_v26  ;;  %v1070_v21 = vadd.f32 %v6493_v47, %v6492_v49  ;;  %v5371_v27 = vand.u32 4294901760, %v1327_v60 }
 0x136   :  { %v5268_v39 = vand.u32 4294901760, %v1337_v5  ;;  %v1336_v57 = vmax.f32 %v1313_v33, 0.0  ;;  %v5280_v29 = vsub.f32 %v1334_v16, %v5257_v19  ;;  %v5308_v59 = vand.u32 4294901760, %v5266_v15  ;;  %v6496_v33 = vld [vmem:[#allocation10_spill] sm:$0xff] }
 0x137   :  { %6491 = vst [vmem:[#allocation14_spill] sm:$0xff] %v5366_v46  ;;  %v1325_v16 = vmax.f32 %v5332_v44, 0.0  ;;  %v5377_v56 = vsub.f32 %v1329_v42, %v5335_v31  ;;  %v1723_v0 = vsub.f32 %v5298_v23, %v5347_v32  ;;  %v5383_v8 = vand.u32 4294901760, %v5338_v38  ;;  %v6499_v42 = vld [vmem:[#allocation12_spill] sm:$0xff]  ;;  %v1341_v44 = vld [vmem:[%s6423_s3 + $0x18] sm:$0xff] }
 0x138   :  { %v5283_v14 = vsub.f32 %v1337_v5, %v5268_v39  ;;  %v5285_v43 = vand.u32 4294901760, %v1336_v57  ;;  %4021 = vmatprep.subr.mxu0 %v5268_v39  ;;  %6485 = vst [vmem:[#allocation16_spill] sm:$0xff] %v5308_v59  ;;  %v5329_v10 = vand.u32 4294901760, %v5280_v29  ;;  %v1709_v35 = vsub.f32 %v5266_v15, %v5308_v59  ;;  %v6495_v5 = vld [vmem:[#allocation8_spill] sm:$0xff] }
 0x139   :  { %4022 = vmatpush3.msra.mxu0 %v5268_v39  ;;  %6494 = vst [vmem:[#allocation7_spill] sm:$0xff] %v5383_v8  ;;  %v1064_v6 = vadd.f32 %v6496_v33, %v6495_v5  ;;  %v5388_v12 = vadd.f32 %v6497_v25, %v1070_v21  ;;  %v5391_v20 = vand.u32 4294901760, %v1326_v37  ;;  %v5395_v63 = vsub.f32 %v1328_v30, %v5356_v24  ;;  %v1343_v25 = vld [vmem:[%s6423_s3 + $0x28] sm:$0xff] }
 0x13a   :  { %v5301_v9 = vsub.f32 %v1336_v57, %v5285_v43  ;;  %4023 = vmatprep.subr.mxu0 %v5285_v43  ;;  %v5305_v51 = vand.u32 4294901760, %v5283_v14  ;;  %6487 = vst [vmem:[#allocation15_spill] sm:$0xff] %v5329_v10  ;;  %v1716_v40 = vsub.f32 %v5280_v29, %v5329_v10  ;;  %v1710_v18 = vand.u32 4294901760, %v1709_v35  ;;  %v1347_v10 = vld [vmem:[%s6423_s3 + $0x48] sm:$0xff] }
 0x13b   :  { %4024 = vmatpush3.msra.mxu0 %v5285_v43  ;;  %v1324_v57 = vmax.f32 %v5353_v41, 0.0  ;;  %v1730_v3 = vsub.f32 %v5320_v26, %v5366_v46  ;;  %v5401_v4 = vand.u32 4294901760, %v5360_v17  ;;  %v5407_v52 = vadd.f32 %v6499_v42, %v1064_v6 }
 0x13c   :  { %4025 = vmatprep.subr.mxu0 %v5253_v58  ;;  %v1695_v54 = vsub.f32 %v5283_v14, %v5305_v51  ;;  %v5326_v62 = vand.u32 4294901760, %v5301_v9  ;;  %v1717_v22 = vand.u32 4294901760, %v1716_v40  ;;  %v5409_v36 = vand.u32 4294901760, %v1325_v16 }
 0x13d   :  { %4026 = vmatpush3.msra.mxu0 %v5253_v58  ;;  %6498 = vst [vmem:[#allocation9_spill] sm:$0xff] %v5401_v4  ;;  %v5413_v13 = vsub.f32 %v1327_v60, %v5371_v27  ;;  %v1724_v30 = vand.u32 4294901760, %v1723_v0  ;;  %v5419_v55 = vand.u32 4294901760, %v5377_v56  ;;  %v5429_v60 = vsub.f32 %v1339_v11, %v5374_v28  ;;  %v1342_v11 = vld [vmem:[%s6423_s3 + $0x20] sm:$0xff] }
 0x13e   :  { %4027 = vmatprep.subr.mxu0 %v5257_v19  ;;  %v1696_v61 = vand.u32 4294901760, %v1695_v54  ;;  %v1702_v7 = vsub.f32 %v5301_v9, %v5326_v62  ;;  %v1737_v54 = vsub.f32 %v5338_v38, %v5383_v8  ;;  %v5431_v35 = vand.u32 4294901760, %v1340_v1 }
 0x13f   :  { %4028 = vmatpush3.msra.mxu0 %v5257_v19  ;;  %6500 = vst [vmem:[#allocation8_spill] sm:$0xff] %v5419_v55  ;;  %v5434_v53 = vsub.f32 %v1326_v37, %v5391_v20  ;;  %v1731_v41 = vand.u32 4294901760, %v1730_v3  ;;  %v5440_v40 = vand.u32 4294901760, %v5395_v63  ;;  %v1322_v49 = vmax.f32 %v5407_v52, 0.0 }
 0x140   :  { %4029 = vmatprep.subr.mxu0 %v5263_v45  ;;  %4077 = vmatprep.subr.mxu1 %v1696_v61  ;;  %v1703_v34 = vand.u32 4294901760, %v1702_v7  ;;  %v5425_v7 = vand.u32 4294901760, %v1324_v57  ;;  %v5447_v37 = vand.u32 4294901760, %v1341_v44  ;;  %v5450_v47 = vsub.f32 %v1325_v16, %v5409_v36 }
 0x141   :  { %4030 = vmatpush3.msra.mxu0 %v5263_v45  ;;  %4078 = vmatpush3.msra.mxu1 %v1696_v61  ;;  %v1323_v61 = vmax.f32 %v5388_v12, 0.0  ;;  %6501 = vst [vmem:[#allocation10_spill] sm:$0xff] %v5440_v40  ;;  %v1738_v21 = vand.u32 4294901760, %v1737_v54  ;;  %v5456_v0 = vand.u32 4294901760, %v5413_v13  ;;  %v6439_v33 = vand.u32 4294901760, %v5429_v60 }
 0x142   :  { %4031 = vmatprep.subr.mxu0 %v5277_v50  ;;  %4079 = vmatprep.subr.mxu1 %v1703_v34  ;;  %6502 = vst [vmem:[#allocation11_spill] sm:$0xff] %v5447_v37  ;;  %v5463_v16 = vsub.f32 %v1340_v1, %v5431_v35  ;;  %v5465_v6 = vand.u32 4294901760, %v1342_v11  ;;  %v5471_v12 = vsub.f32 %v1324_v57, %v5425_v7  ;;  %v5477_v42 = vand.u32 4294901760, %v5434_v53 }
 0x143   :  { %4032 = vmatpush3.msra.mxu0 %v5277_v50  ;;  %4080 = vmatpush3.msra.mxu1 %v1703_v34  ;;  %v1744_v34 = vsub.f32 %v5360_v17, %v5401_v4  ;;  %6503 = vst [vmem:[#allocation12_spill] sm:$0xff] %v5456_v0  ;;  %v5458_v5 = vand.u32 4294901760, %v1323_v61  ;;  %v1758_v3 = vsub.f32 %v5395_v63, %v5440_v40  ;;  %v5479_v1 = vand.u32 4294901760, %v1322_v49 }
 0x144   :  { %4033 = vmatprep.subr.mxu0 %v5294_v2  ;;  %4081 = vmatprep.subr.mxu1 %v1710_v18  ;;  %6504 = vst [vmem:[#allocation17_spill] sm:$0xff] %v5477_v42  ;;  %v5483_v52 = vsub.f32 %v1341_v44, %v5447_v37  ;;  %v5489_v54 = vand.u32 4294901760, %v5450_v47  ;;  %v1544_v44 = vsub.f32 %v5429_v60, %v6439_v33  ;;  %v5508_v40 = vand.u32 4294901760, %v5471_v12 }
 0x145   :  { %4034 = vmatpush3.msra.mxu0 %v5294_v2  ;;  %4082 = vmatpush3.msra.mxu1 %v1710_v18  ;;  %v1751_v18 = vsub.f32 %v5377_v56, %v5419_v55  ;;  %6505 = vst [vmem:[#allocation18_spill] sm:$0xff] %v5479_v1  ;;  %v5514_v33 = vsub.f32 %v1322_v49, %v5479_v1 }
 0x146   :  { %4035 = vmatprep.subr.mxu0 %v5316_v48  ;;  %4083 = vmatprep.subr.mxu1 %v1717_v22  ;;  %6506 = vst [vmem:[#allocation19_spill] sm:$0xff] %v5489_v54  ;;  %6507 = vst [vmem:[#allocation20_spill] sm:$0xff] %v5508_v40 }
 0x147   :  { %4036 = vmatpush3.msra.mxu0 %v5316_v48  ;;  %4084 = vmatpush3.msra.mxu1 %v1717_v22  ;;  %v1745_v22 = vand.u32 4294901760, %v1744_v34  ;;  %v1752_v57 = vand.u32 4294901760, %v1751_v18  ;;  %v5494_v34 = vsub.f32 %v1323_v61, %v5458_v5  ;;  %v1344_v18 = vld [vmem:[%s6423_s3 + $0x30] sm:$0xff]  ;;  %v1772_v61 = vsub.f32 %v5434_v53, %v5477_v42 }
 0x148   :  { %4037 = vmatprep.subr.mxu0 %v5335_v31  ;;  %4085 = vmatprep.subr.mxu1 %v1724_v30  ;;  %v5527_v49 = vand.u32 4294901760, %v1344_v18 }
 0x149   :  { %4038 = vmatpush3.msra.mxu0 %v5335_v31  ;;  %4086 = vmatpush3.msra.mxu1 %v1724_v30  ;;  %v1765_v30 = vsub.f32 %v5413_v13, %v5456_v0  ;;  %v1759_v0 = vand.u32 4294901760, %v1758_v3  ;;  %v1345_v3 = vld [vmem:[%s6423_s3 + $0x38] sm:$0xff]  ;;  %v5534_v8 = vand.u32 4294901760, %v5494_v34 }
 0x14a   :  { %4039 = vmatprep.subr.mxu0 %v5356_v24  ;;  %4087 = vmatprep.subr.mxu1 %v1731_v41  ;;  %v5540_v46 = vand.u32 4294901760, %v1345_v3  ;;  %v5555_v32 = vsub.f32 %v1344_v18, %v5527_v49 }
 0x14b   :  { %4040 = vmatpush3.msra.mxu0 %v5356_v24  ;;  %4088 = vmatpush3.msra.mxu1 %v1731_v41  ;;  %v5491_v41 = vand.u32 4294901760, %v1343_v25  ;;  %v1766_v42 = vand.u32 4294901760, %v1765_v30  ;;  %6509 = vst [vmem:[#allocation21_spill] sm:$0xff] %v5534_v8  ;;  %v1773_v30 = vand.u32 4294901760, %v1772_v61  ;;  %v1346_v61 = vld [vmem:[%s6423_s3 + $0x40] sm:$0xff] }
 0x14c   :  { %4041 = vmatprep.subr.mxu0 %v5371_v27  ;;  %4089 = vmatprep.subr.mxu1 %v1738_v21  ;;  %v5567_v18 = vsub.f32 %v1345_v3, %v5540_v46  ;;  %v5579_v3 = vand.u32 4294901760, %v1347_v10 }
 0x14d   :  { %4042 = vmatpush3.msra.mxu0 %v5371_v27  ;;  %4090 = vmatpush3.msra.mxu1 %v1738_v21  ;;  %v5525_v55 = vsub.f32 %v1343_v25, %v5491_v41  ;;  %v6508_v21 = vand.u32 4294901760, %v5463_v16  ;;  %v1786_v25 = vsub.f32 %v5471_v12, %v5508_v40 }
 0x14e   :  { %4043 = vmatprep.subr.mxu0 %v5391_v20  ;;  %4091 = vmatprep.subr.mxu1 %v1745_v22 }
 0x14f   :  { %4044 = vmatpush3.msra.mxu0 %v5391_v20  ;;  %4092 = vmatpush3.msra.mxu1 %v1745_v22  ;;  %v5511_v22 = vsub.f32 %v1342_v11, %v5465_v6  ;;  %v1779_v11 = vsub.f32 %v5450_v47, %v5489_v54  ;;  %v1554_v4 = vsub.f32 %v5463_v16, %v6508_v21  ;;  %v5547_v21 = vand.u32 4294901760, %v5514_v33 }
 0x150   :  { %4045 = vmatprep.subr.mxu0 %v5409_v36  ;;  %4093 = vmatprep.subr.mxu1 %v1752_v57  ;;  %v1787_v59 = vand.u32 4294901760, %v1786_v25 }
 0x151   :  { %4046 = vmatpush3.msra.mxu0 %v5409_v36  ;;  %4094 = vmatpush3.msra.mxu1 %v1752_v57  ;;  %v1545_v57 = vand.u32 4294901760, %v1544_v44  ;;  %v1780_v54 = vand.u32 4294901760, %v1779_v11  ;;  %v6511_v11 = vand.u32 4294901760, %v5511_v22 }
 0x152   :  { %4047 = vmatprep.subr.mxu0 %v5425_v7  ;;  %4095 = vmatprep.subr.mxu1 %v1759_v0 }
 0x153   :  { %4048 = vmatpush3.msra.mxu0 %v5425_v7  ;;  %4096 = vmatpush3.msra.mxu1 %v1759_v0  ;;  %v6510_v0 = vand.u32 4294901760, %v5483_v52  ;;  %v1574_v40 = vsub.f32 %v5511_v22, %v6511_v11 }
 0x154   :  { %4049 = vmatprep.subr.mxu0 %v5458_v5  ;;  %4097 = vmatprep.subr.mxu1 %v1766_v42 }
 0x155   :  { %4050 = vmatpush3.msra.mxu0 %v5458_v5  ;;  %4098 = vmatpush3.msra.mxu1 %v1766_v42  ;;  %v1564_v44 = vsub.f32 %v5483_v52, %v6510_v0  ;;  %v1555_v42 = vand.u32 4294901760, %v1554_v4  ;;  %v1793_v0 = vsub.f32 %v5494_v34, %v5534_v8 }
 0x156   :  { %4051 = vmatprep.subr.mxu0 %v5479_v1  ;;  %4099 = vmatprep.subr.mxu1 %v1773_v30 }
 0x157   :  { %4052 = vmatpush3.msra.mxu0 %v5479_v1  ;;  %4100 = vmatpush3.msra.mxu1 %v1773_v30  ;;  %v5569_v1 = vand.u32 4294901760, %v1346_v61  ;;  %v1565_v4 = vand.u32 4294901760, %v1564_v44  ;;  %v1800_v30 = vsub.f32 %v5514_v33, %v5547_v21  ;;  %v1794_v8 = vand.u32 4294901760, %v1793_v0 }
 0x158   :  { %4054 = vmatmul.mubr.f32.vlgmr.msra.gmra.mxu0 %v1545_v57  ;;  %4101 = vmatprep.subr.mxu1 %v1780_v54  ;;  %v6512_v57 = vand.u32 4294901760, %v5525_v55  ;;  %v6466_v44 = vand.u32 4294901760, %v5567_v18 }
 0x159   :  { %4133 = vmatprep.subr.mxu0 %v5283_v14  ;;  %4102 = vmatpush3.msra.mxu1 %v1780_v54  ;;  %v1348_v54 = vld [vmem:[%s6423_s3 + $0x50] sm:$0xff]  ;;  %v1801_v11 = vand.u32 4294901760, %v1800_v30 }
 0x15a   :  { %4134 = vmatpush3.msra.mxu0 %v5283_v14  ;;  %4103 = vmatprep.subr.mxu1 %v1787_v59  ;;  %v1584_v25 = vsub.f32 %v5525_v55, %v6512_v57  ;;  %v1575_v14 = vand.u32 4294901760, %v1574_v40  ;;  %v5588_v57 = vsub.f32 %v1346_v61, %v5569_v1  ;;  %v5598_v40 = vsub.f32 %v1347_v10, %v5579_v3  ;;  %v1350_v10 = vld [vmem:[%s6423_s3 + $0x60] sm:$0xff] }
 0x15b   :  { %4135 = vmatprep.subr.mxu0 %v5301_v9  ;;  %4056 = vmatprep.mubr.f32.mxu0 %v1555_v42  ;;  %v1349_v42 = vld [vmem:[%s6423_s3 + $0x58] sm:$0xff]  ;;  %v5600_v61 = vand.u32 4294901760, %v1348_v54 }
 0x15c   :  { %4104 = vmatpush3.msra.mxu1 %v1787_v59  ;;  %4136 = vmatpush3.msra.mxu0 %v5301_v9  ;;  %v1585_v0 = vand.u32 4294901760, %v1584_v25  ;;  %v6513_v59 = vand.u32 4294901760, %v5555_v32  ;;  %v5608_v30 = vand.u32 4294901760, %v1349_v42  ;;  %v6465_v25 = vand.u32 4294901760, %v5598_v40 }
 0x15d   :  { %4057 = vmatmul.mubr.f32.gmra.mxu0 %v1565_v4  ;;  %4105 = vmatprep.subr.mxu1 %v1794_v8  ;;  %v6464_v4 = vand.u32 4294901760, %v5588_v57 }
 0x15e   :  { %4137 = vmatprep.subr.mxu0 %v5266_v15  ;;  %4106 = vmatpush3.msra.mxu1 %v1794_v8  ;;  %v1594_v9 = vsub.f32 %v5555_v32, %v6513_v59  ;;  %v1604_v8 = vsub.f32 %v5567_v18, %v6466_v44  ;;  %v5632_v59 = vand.u32 4294901760, %v1350_v10 }
 0x15f   :  { %4138 = vmatpush3.msra.mxu0 %v5266_v15  ;;  %4107 = vmatprep.subr.mxu1 %v1801_v11 }
 0x160   :  { %4139 = vmatprep.subr.mxu0 %v5280_v29  ;;  %4059 = vmatprep.mubr.f32.mxu0 %v1575_v14  ;;  %v1595_v15 = vand.u32 4294901760, %v1594_v9  ;;  %v5617_v14 = vsub.f32 %v1348_v54, %v5600_v61  ;;  %v5630_v54 = vsub.f32 %v1349_v42, %v5608_v30  ;;  %v1352_v42 = vld [vmem:[%s6423_s3 + $0x70] sm:$0xff] }
 0x161   :  { %4108 = vmatpush3.msra.mxu1 %v1801_v11  ;;  %4140 = vmatpush3.msra.mxu0 %v5280_v29  ;;  %v1351_v29 = vld [vmem:[%s6423_s3 + $0x68] sm:$0xff]  ;;  %v1605_v11 = vand.u32 4294901760, %v1604_v8  ;;  %v5666_v44 = vand.u32 4294901760, %v1352_v42 }
 0x162   :  { %4060 = vmatmul.mubr.f32.gmra.mxu0 %v1585_v0  ;;  %4110 = vmatmul.mubr.f32.vlgmr.msra.gmra.mxu1 %v5374_v28  ;;  %v1614_v0 = vsub.f32 %v5588_v57, %v6464_v4  ;;  %v6469_v9 = vand.u32 4294901760, %v5617_v14  ;;  %v5641_v8 = vand.u32 4294901760, %v1351_v29  ;;  %v1643_v4 = vand.u32 4294901760, %v5630_v54 }
 0x163   :  { %4141 = vmatprep.subr.mxu0 %v5298_v23  ;;  %4189 = vmatprep.subr.mxu1 %v5268_v39 }
 0x164   :  { %4142 = vmatpush3.msra.mxu0 %v5298_v23  ;;  %4190 = vmatpush3.msra.mxu1 %v5268_v39  ;;  %v1624_v23 = vsub.f32 %v5598_v40, %v6465_v25  ;;  %v5651_v25 = vsub.f32 %v1350_v10, %v5632_v59  ;;  %v5664_v10 = vsub.f32 %v1351_v29, %v5641_v8 }
 0x165   :  { %4143 = vmatprep.subr.mxu0 %v5320_v26  ;;  %4191 = vmatprep.subr.mxu1 %v5285_v43 }
 0x166   :  { %4062 = vmatprep.mubr.f32.mxu0 %v1595_v15  ;;  %4112 = vmatprep.mubr.f32.mxu1 %v5431_v35  ;;  %v1615_v15 = vand.u32 4294901760, %v1614_v0  ;;  %v1634_v0 = vsub.f32 %v5617_v14, %v6469_v9  ;;  %v5682_v9 = vsub.f32 %v1352_v42, %v5666_v44 }
 0x167   :  { %4144 = vmatpush3.msra.mxu0 %v5320_v26  ;;  %4192 = vmatpush3.msra.mxu1 %v5285_v43  ;;  %v1353_v26 = vld [vmem:[%s6423_s3 + $0x78] sm:$0xff] }
 0x168   :  { %4063 = vmatmul.mubr.f32.gmra.mxu0 %v1605_v11  ;;  %4113 = vmatmul.mubr.f32.gmra.mxu1 %v5447_v37  ;;  %v1625_v11 = vand.u32 4294901760, %v1624_v23  ;;  %v1653_v23 = vand.u32 4294901760, %v5651_v25  ;;  %v5675_v37 = vand.u32 4294901760, %v1353_v26  ;;  %v1635_v29 = vand.u32 4294901760, %v1634_v0 }
 0x169   :  { %4145 = vmatprep.subr.mxu0 %v5338_v38  ;;  %4193 = vmatprep.subr.mxu1 %v5253_v58  ;;  %v1673_v42 = vand.u32 4294901760, %v5682_v9 }
 0x16a   :  { %4146 = vmatpush3.msra.mxu0 %v5338_v38  ;;  %4194 = vmatpush3.msra.mxu1 %v5253_v58  ;;  %v1644_v38 = vsub.f32 %v5630_v54, %v1643_v4  ;;  %v5692_v0 = vsub.f32 %v1353_v26, %v5675_v37 }
 0x16b   :  { %4147 = vmatprep.subr.mxu0 %v5360_v17  ;;  %4195 = vmatprep.subr.mxu1 %v5257_v19 }
 0x16c   :  { %4065 = vmatprep.mubr.f32.mxu0 %v1615_v15  ;;  %4115 = vmatprep.mubr.f32.mxu1 %v5465_v6  ;;  %v1663_v15 = vand.u32 4294901760, %v5664_v10 }
 0x16d   :  { %4148 = vmatpush3.msra.mxu0 %v5360_v17  ;;  %4196 = vmatpush3.msra.mxu1 %v5257_v19  ;;  %v1645_v17 = vand.u32 4294901760, %v1644_v38  ;;  %v1683_v38 = vand.u32 4294901760, %v5692_v0 }
 0x16e   :  { %4066 = vmatmul.mubr.f32.gmra.mxu0 %v1625_v11  ;;  %4116 = vmatmul.mubr.f32.gmra.mxu1 %v5491_v41  ;;  %v1654_v11 = vsub.f32 %v5651_v25, %v1653_v23 }
 0x16f   :  { %4149 = vmatprep.subr.mxu0 %v5377_v56  ;;  %4197 = vmatprep.subr.mxu1 %v5263_v45 }
 0x170   :  { %4150 = vmatpush3.msra.mxu0 %v5377_v56  ;;  %4198 = vmatpush3.msra.mxu1 %v5263_v45  ;;  %v1664_v56 = vsub.f32 %v5664_v10, %v1663_v15  ;;  %v1655_v26 = vand.u32 4294901760, %v1654_v11 }
 0x171   :  { %4151 = vmatprep.subr.mxu0 %v5395_v63  ;;  %4199 = vmatprep.subr.mxu1 %v5277_v50 }
 0x172   :  { %4068 = vmatprep.mubr.f32.mxu0 %v1635_v29  ;;  %4118 = vmatprep.mubr.f32.mxu1 %v5527_v49  ;;  %v1665_v29 = vand.u32 4294901760, %v1664_v56  ;;  %v6521_v56 = vld [vmem:[#allocation14_spill] sm:$0xff] }
 0x173   :  { %4152 = vmatpush3.msra.mxu0 %v5395_v63  ;;  %4200 = vmatpush3.msra.mxu1 %v5277_v50  ;;  %v1674_v63 = vsub.f32 %v5682_v9, %v1673_v42 }
 0x174   :  { %4069 = vmatmul.mubr.f32.gmra.mxu0 %v1645_v17  ;;  %4119 = vmatmul.mubr.f32.gmra.mxu1 %v5540_v46  ;;  %v1684_v17 = vsub.f32 %v5692_v0, %v1683_v38 }
 0x175   :  { %4153 = vmatprep.subr.mxu0 %v5413_v13  ;;  %4201 = vmatprep.subr.mxu1 %v5294_v2 }
 0x176   :  { %4154 = vmatpush3.msra.mxu0 %v5413_v13  ;;  %4202 = vmatpush3.msra.mxu1 %v5294_v2  ;;  %v1675_v13 = vand.u32 4294901760, %v1674_v63  ;;  %v1685_v11 = vand.u32 4294901760, %v1684_v17 }
 0x177   :  { %4155 = vmatprep.subr.mxu0 %v5434_v53  ;;  %4203 = vmatprep.subr.mxu1 %v5316_v48 }
 0x178   :  { %4071 = vmatprep.mubr.f32.mxu0 %v1655_v26  ;;  %4121 = vmatprep.mubr.f32.mxu1 %v5569_v1  ;;  %v6522_v26 = vand.u32 4294901760, %v5463_v16 }
 0x179   :  { %4156 = vmatpush3.msra.mxu0 %v5434_v53  ;;  %4204 = vmatpush3.msra.mxu1 %v5316_v48  ;;  %v6514_v53 = vld [vmem:[#allocation6_spill] sm:$0xff] }
 0x17a   :  { %4072 = vmatmul.mubr.f32.gmra.mxu0 %v1665_v29  ;;  %4122 = vmatmul.mubr.f32.gmra.mxu1 %v5579_v3  ;;  %v6524_v29 = vld [vmem:[#allocation7_spill] sm:$0xff] }
 0x17b   :  { %4157 = vmatprep.subr.mxu0 %v5450_v47  ;;  %4205 = vmatprep.subr.mxu1 %v5335_v31 }
 0x17c   :  { %4158 = vmatpush3.msra.mxu0 %v5450_v47  ;;  %4206 = vmatpush3.msra.mxu1 %v5335_v31  ;;  %v6515_v47 = vld [vmem:[#allocation16_spill] sm:$0xff] }
 0x17d   :  { %4159 = vmatprep.subr.mxu0 %v5471_v12  ;;  %4207 = vmatprep.subr.mxu1 %v5356_v24 }
 0x17e   :  { %4074 = vmatprep.mubr.f32.mxu0 %v1675_v13  ;;  %4124 = vmatprep.mubr.f32.mxu1 %v5600_v61 }
 0x17f   :  { %4160 = vmatpush3.msra.mxu0 %v5471_v12  ;;  %4208 = vmatpush3.msra.mxu1 %v5356_v24  ;;  %v6519_v12 = vand.u32 4294901760, %v5429_v60 }
 0x180   :  { %4075 = vmatmul.mubr.f32.gmra.mxu0 %v1685_v11  ;;  %4125 = vmatmul.mubr.f32.gmra.mxu1 %v5608_v30 }
 0x181   :  { %4161 = vmatprep.subr.mxu0 %v5494_v34  ;;  %4209 = vmatprep.subr.mxu1 %v5371_v27 }
 0x182   :  { %4162 = vmatpush3.msra.mxu0 %v5494_v34  ;;  %4210 = vmatpush3.msra.mxu1 %v5371_v27  ;;  %v6520_v34 = vld [vmem:[#allocation13_spill] sm:$0xff] }
 0x183   :  { %4163 = vmatprep.subr.mxu0 %v5514_v33  ;;  %4211 = vmatprep.subr.mxu1 %v5391_v20 }
 0x184   :  { %4127 = vmatprep.mubr.f32.mxu1 %v5632_v59  ;;  %4164 = vmatpush3.msra.mxu0 %v5514_v33  ;;  %v6517_v33 = vld [vmem:[#allocation15_spill] sm:$0xff] }
 0x185   :  { %4165 = vmatprep.mubr.f32.mxu0 %v6514_v53  ;;  %4212 = vmatpush3.msra.mxu1 %v5391_v20 }
 0x186   :  { %4128 = vmatmul.mubr.f32.gmra.mxu1 %v5641_v8  ;;  %4166 = vmatmul.mubr.f32.vlgmr.msra.gmra.mxu0 %v5429_v60  ;;  %v6523_v60 = vand.u32 4294901760, %v5483_v52 }
 0x187   :  { %4213 = vmatprep.subr.mxu1 %v5409_v36  ;;  %4245 = vmatprep.subr.mxu0 %v5305_v51 }
 0x188   :  { %4214 = vmatpush3.msra.mxu1 %v5409_v36  ;;  %4246 = vmatpush3.msra.mxu0 %v5305_v51  ;;  %v6516_v51 = vld [vmem:[#allocation18_spill] sm:$0xff] }
 0x189   :  { %4215 = vmatprep.subr.mxu1 %v5425_v7  ;;  %4247 = vmatprep.subr.mxu0 %v5326_v62 }
 0x18a   :  { %4130 = vmatprep.mubr.f32.mxu1 %v5666_v44  ;;  %4168 = vmatprep.mubr.f32.mxu0 %v5463_v16  ;;  %v6527_v16 = vand.u32 4294901760, %v5525_v55 }
 0x18b   :  { %4216 = vmatpush3.msra.mxu1 %v5425_v7  ;;  %4248 = vmatpush3.msra.mxu0 %v5326_v62  ;;  %v6518_v62 = vand.u32 4294901760, %v6514_v53 }
 0x18c   :  { %4131 = vmatmul.mubr.f32.gmra.mxu1 %v5675_v37  ;;  %4169 = vmatmul.mubr.f32.gmra.mxu0 %v5483_v52  ;;  %v6528_v52 = vld [vmem:[#allocation8_spill] sm:$0xff] }
 0x18d   :  { %4217 = vmatprep.subr.mxu1 %v5458_v5  ;;  %4249 = vmatprep.subr.mxu0 %v6515_v47 }
 0x18e   :  { %4218 = vmatpush3.msra.mxu1 %v5458_v5  ;;  %4250 = vmatpush3.msra.mxu0 %v6515_v47 }
 0x18f   :  { %4219 = vmatprep.subr.mxu1 %v6516_v51  ;;  %4251 = vmatprep.subr.mxu0 %v6517_v33 }
 0x190   :  { %4171 = vmatprep.mubr.f32.mxu0 %v5511_v22  ;;  %4220 = vmatpush3.msra.mxu1 %v6516_v51 }
 0x191   :  { %4221 = vmatprep.mubr.f32.mxu1 %v6518_v62  ;;  %4252 = vmatpush3.msra.mxu0 %v6517_v33 }
 0x192   :  { %4172 = vmatmul.mubr.f32.gmra.mxu0 %v5525_v55  ;;  %4222 = vmatmul.mubr.f32.vlgmr.msra.gmra.mxu1 %v6519_v12  ;;  %v6531_v55 = vand.u32 4294901760, %v5567_v18 }
 0x193   :  { %4253 = vmatprep.subr.mxu0 %v6520_v34  ;;  %4301 = vmatprep.subr.mxu1 %v5268_v39 }
 0x194   :  { %4254 = vmatpush3.msra.mxu0 %v6520_v34  ;;  %4302 = vmatpush3.msra.mxu1 %v5268_v39  ;;  %v6525_v39 = vld [vmem:[#allocation9_spill] sm:$0xff] }
 0x195   :  { %4255 = vmatprep.subr.mxu0 %v6521_v56  ;;  %4303 = vmatprep.subr.mxu1 %v5285_v43 }
 0x196   :  { %4174 = vmatprep.mubr.f32.mxu0 %v5555_v32  ;;  %4224 = vmatprep.mubr.f32.mxu1 %v6522_v26 }
 0x197   :  { %4256 = vmatpush3.msra.mxu0 %v6521_v56  ;;  %4304 = vmatpush3.msra.mxu1 %v5285_v43  ;;  %v6526_v43 = vand.u32 4294901760, %v5511_v22  ;;  %v6532_v22 = vld [vmem:[#allocation12_spill] sm:$0xff] }
 0x198   :  { %4175 = vmatmul.mubr.f32.gmra.mxu0 %v5567_v18  ;;  %4225 = vmatmul.mubr.f32.gmra.mxu1 %v6523_v60  ;;  %v6536_v18 = vld [vmem:[#allocation19_spill] sm:$0xff] }
 0x199   :  { %4257 = vmatprep.subr.mxu0 %v6524_v29  ;;  %4305 = vmatprep.subr.mxu1 %v5253_v58 }
 0x19a   :  { %4258 = vmatpush3.msra.mxu0 %v6524_v29  ;;  %4306 = vmatpush3.msra.mxu1 %v5253_v58  ;;  %v6529_v58 = vld [vmem:[#allocation10_spill] sm:$0xff] }
 0x19b   :  { %4259 = vmatprep.subr.mxu0 %v6525_v39  ;;  %4307 = vmatprep.subr.mxu1 %v5257_v19 }
 0x19c   :  { %4177 = vmatprep.mubr.f32.mxu0 %v5588_v57  ;;  %4227 = vmatprep.mubr.f32.mxu1 %v6526_v43 }
 0x19d   :  { %4260 = vmatpush3.msra.mxu0 %v6525_v39  ;;  %4308 = vmatpush3.msra.mxu1 %v5257_v19  ;;  %v6530_v19 = vand.u32 4294901760, %v5555_v32  ;;  %v6535_v32 = vand.u32 4294901760, %v5598_v40 }
 0x19e   :  { %4178 = vmatmul.mubr.f32.gmra.mxu0 %v5598_v40  ;;  %4228 = vmatmul.mubr.f32.gmra.mxu1 %v6527_v16 }
 0x19f   :  { %4261 = vmatprep.subr.mxu0 %v6528_v52  ;;  %4309 = vmatprep.subr.mxu1 %v5263_v45 }
 0x1a0   :  { %4262 = vmatpush3.msra.mxu0 %v6528_v52  ;;  %4310 = vmatpush3.msra.mxu1 %v5263_v45  ;;  %v6533_v45 = vld [vmem:[#allocation17_spill] sm:$0xff] }
 0x1a1   :  { %4263 = vmatprep.subr.mxu0 %v6529_v58  ;;  %4311 = vmatprep.subr.mxu1 %v5277_v50 }
 0x1a2   :  { %4180 = vmatprep.mubr.f32.mxu0 %v5617_v14  ;;  %4230 = vmatprep.mubr.f32.mxu1 %v6530_v19 }
 0x1a3   :  { %4264 = vmatpush3.msra.mxu0 %v6529_v58  ;;  %4312 = vmatpush3.msra.mxu1 %v5277_v50  ;;  %v6534_v50 = vand.u32 4294901760, %v5588_v57  ;;  %v6539_v57 = vld [vmem:[#allocation21_spill] sm:$0xff] }
 0x1a4   :  { %4181 = vmatmul.mubr.f32.gmra.mxu0 %v5630_v54  ;;  %4231 = vmatmul.mubr.f32.gmra.mxu1 %v6531_v55 }
 0x1a5   :  { %4265 = vmatprep.subr.mxu0 %v6532_v22  ;;  %4313 = vmatprep.subr.mxu1 %v5294_v2 }
 0x1a6   :  { %4266 = vmatpush3.msra.mxu0 %v6532_v22  ;;  %4314 = vmatpush3.msra.mxu1 %v5294_v2  ;;  %v6537_v2 = vld [vmem:[#allocation20_spill] sm:$0xff] }
 0x1a7   :  { %4267 = vmatprep.subr.mxu0 %v6533_v45  ;;  %4315 = vmatprep.subr.mxu1 %v5316_v48 }
 0x1a8   :  { %4183 = vmatprep.mubr.f32.mxu0 %v5651_v25  ;;  %4233 = vmatprep.mubr.f32.mxu1 %v6534_v50 }
 0x1a9   :  { %4268 = vmatpush3.msra.mxu0 %v6533_v45  ;;  %4316 = vmatpush3.msra.mxu1 %v5316_v48  ;;  %v6538_v48 = vand.u32 4294901760, %v5617_v14 }
 0x1aa   :  { %4184 = vmatmul.mubr.f32.gmra.mxu0 %v5664_v10  ;;  %4234 = vmatmul.mubr.f32.gmra.mxu1 %v6535_v32 }
 0x1ab   :  { %4269 = vmatprep.subr.mxu0 %v6536_v18  ;;  %4317 = vmatprep.subr.mxu1 %v5335_v31 }
 0x1ac   :  { %4270 = vmatpush3.msra.mxu0 %v6536_v18  ;;  %4318 = vmatpush3.msra.mxu1 %v5335_v31  ;;  %v6540_v31 = vld [vmem:[#allocation5_spill] sm:$0xff] }
 0x1ad   :  { %4271 = vmatprep.subr.mxu0 %v6537_v2  ;;  %4319 = vmatprep.subr.mxu1 %v5356_v24 }
 0x1ae   :  { %4186 = vmatprep.mubr.f32.mxu0 %v5682_v9  ;;  %4236 = vmatprep.mubr.f32.mxu1 %v6538_v48 }
 0x1af   :  { %4272 = vmatpush3.msra.mxu0 %v6537_v2  ;;  %4320 = vmatpush3.msra.mxu1 %v5356_v24  ;;  %v6541_v24 = vld [vmem:[#allocation11_spill] sm:$0xff] }
 0x1b0   :  { %4187 = vmatmul.mubr.f32.gmra.mxu0 %v5692_v0  ;;  %4237 = vmatmul.mubr.f32.gmra.mxu1 %v1643_v4 }
 0x1b1   :  { %4273 = vmatprep.subr.mxu0 %v6539_v57  ;;  %4321 = vmatprep.subr.mxu1 %v5371_v27 }
 0x1b2   :  { %4274 = vmatpush3.msra.mxu0 %v6539_v57  ;;  %4322 = vmatpush3.msra.mxu1 %v5371_v27  ;;  %v5897_v27 = vpop.permute.xlu1 %1442 }
 0x1b3   :  { %4275 = vmatprep.subr.mxu0 %v5547_v21  ;;  %4323 = vmatprep.subr.mxu1 %v5391_v20 }
 0x1b4   :  { %4239 = vmatprep.mubr.f32.mxu1 %v1653_v23  ;;  %4276 = vmatpush3.msra.mxu0 %v5547_v21 }
 0x1b5   :  { %4277 = vmatprep.mubr.f32.mxu0 %v6540_v31  ;;  %4324 = vmatpush3.msra.mxu1 %v5391_v20 }
 0x1b6   :  { %4240 = vmatmul.mubr.f32.gmra.mxu1 %v1663_v15  ;;  %4278 = vmatmul.mubr.f32.vlgmr.msra.gmra.mxu0 %v5374_v28  ;;  %v5901_v20 = vpop.permute.xlu1 %1432 }
 0x1b7   :  { %4325 = vmatprep.subr.mxu1 %v5409_v36  ;;  %4242 = vmatprep.mubr.f32.mxu1 %v1673_v42 }
 0x1b8   :  { %4326 = vmatpush3.msra.mxu1 %v5409_v36  ;;  %4280 = vmatprep.mubr.f32.mxu0 %v5431_v35 }
 0x1b9   :  { %4327 = vmatprep.subr.mxu1 %v5425_v7 }
 0x1ba   :  { %4328 = vmatpush3.msra.mxu1 %v5425_v7  ;;  %4281 = vmatmul.mubr.f32.gmra.mxu0 %v6541_v24  ;;  %v1423_v7 = vpop.permute.xlu1 %1422 }
 0x1bb   :  { %4243 = vmatmul.mubr.f32.gmra.mxu1 %v1683_v38  ;;  %4329 = vmatprep.subr.mxu1 %v5458_v5 }
 0x1bc   :  { %4330 = vmatpush3.msra.mxu1 %v5458_v5  ;;  %4283 = vmatprep.mubr.f32.mxu0 %v5465_v6 }
 0x1bd   :  { %4331 = vmatprep.subr.mxu1 %v6516_v51  ;;  %4333 = vmatprep.mubr.f32.mxu1 %v6540_v31 }
 0x1be   :  { %4332 = vmatpush3.msra.mxu1 %v6516_v51  ;;  %4284 = vmatmul.mubr.f32.gmra.mxu0 %v5491_v41  ;;  %v1413_v5 = vpop.permute.xlu1 %1412 }
 0x1bf   :  { %4334 = vmatmul.mubr.f32.vlgmr.msra.gmra.mxu1 %v5374_v28  ;;  %4286 = vmatprep.mubr.f32.mxu0 %v5527_v49 }
 0x1c0   :  { %4336 = vmatprep.mubr.f32.mxu1 %v5431_v35 }
 0x1c2   :  { %4287 = vmatmul.mubr.f32.gmra.mxu0 %v5540_v46 }
 0x1c3   :  { %4337 = vmatmul.mubr.f32.gmra.mxu1 %v6541_v24  ;;  %4289 = vmatprep.mubr.f32.mxu0 %v5569_v1 }
 0x1c4   :  { %4339 = vmatprep.mubr.f32.mxu1 %v5465_v6 }
 0x1c6   :  { %4290 = vmatmul.mubr.f32.gmra.mxu0 %v5579_v3 }
 0x1c7   :  { %4340 = vmatmul.mubr.f32.gmra.mxu1 %v5491_v41  ;;  %4292 = vmatprep.mubr.f32.mxu0 %v5600_v61 }
 0x1c8   :  { %4342 = vmatprep.mubr.f32.mxu1 %v5527_v49 }
 0x1ca   :  { %4293 = vmatmul.mubr.f32.gmra.mxu0 %v5608_v30 }
 0x1cb   :  { %4343 = vmatmul.mubr.f32.gmra.mxu1 %v5540_v46  ;;  %4295 = vmatprep.mubr.f32.mxu0 %v5632_v59  ;;  %v5895_v46 = vpop.permute.xlu0 %1447 }
 0x1cc   :  { %4345 = vmatprep.mubr.f32.mxu1 %v5569_v1  ;;  %v1403_v1 = vpop.permute.xlu1 %1402 }
 0x1ce   :  { %4296 = vmatmul.mubr.f32.gmra.mxu0 %v5641_v8 }
 0x1cf   :  { %4346 = vmatmul.mubr.f32.gmra.mxu1 %v5579_v3  ;;  %4298 = vmatprep.mubr.f32.mxu0 %v5666_v44  ;;  %v5899_v28 = vpop.permute.xlu0 %1437 }
 0x1d0   :  { %4348 = vmatprep.mubr.f32.mxu1 %v5600_v61  ;;  %v1393_v49 = vpop.permute.xlu1 %1392 }
 0x1d2   :  { %4299 = vmatmul.mubr.f32.gmra.mxu0 %v5675_v37 }
 0x1d3   :  { %4349 = vmatmul.mubr.f32.gmra.mxu1 %v5608_v30  ;;  %v1428_v36 = vpop.permute.xlu0 %1427 }
 0x1d4   :  { %4351 = vmatprep.mubr.f32.mxu1 %v5632_v59  ;;  %v6470_v59 = vmov 0.0  }
 0x1d5   :  { %4357 = vmatprep.subr.mxu0 %v6470_v59  ;;  %4392 = vmatprep.subr.mxu1 %v6470_v59 }
 0x1d6   :  { %4389 = vmatprep.mubr.msk.f32.mxu0 %vm4597_vm1, %v6470_v59 }
 0x1d7   :  { %4352 = vmatmul.mubr.f32.gmra.mxu1 %v5641_v8  ;;  %v1418_v35 = vpop.permute.xlu0 %1417 }
 0x1d8   :  { %4354 = vmatprep.mubr.f32.mxu1 %v5666_v44 }
 0x1db   :  { %4355 = vmatmul.mubr.f32.gmra.mxu1 %v5675_v37  ;;  %v1408_v6 = vpop.permute.xlu0 %1407  ;;  %v1383_v37 = vpop.permute.xlu1 %1382 }
 0x1dc   :  { %4424 = vmatprep.mubr.msk.f32.mxu1 %vm4597_vm1, %v6470_v59 }
 0x1df   :  { %v1398_v41 = vpop.permute.xlu0 %1397  ;;  %v1373_v30 = vpop.permute.xlu1 %1372 }
 0x1e3   :  { %v1388_v3 = vpop.permute.xlu0 %1387 }
 0x1e7   :  { %v1378_v4 = vpop.permute.xlu0 %1377 }
 0x218   :  { %v4055_v21 = vpop.f32.mrf.mxu0 }
 0x219   :  { %v1548_v25 = vadd.f32 %v4055_v21, %v1378_v4 }
 0x21a   :  { %v1537_v44 = vpop.f32.mrf.mxu0 }
 0x21b   :  { %v1538_v9 = vadd.f32 %v1537_v44, %v1373_v30 }
 0x21d   :  { %v4058_v40 = vpop.f32.mrf.mxu0 }
 0x21e   :  { %v1568_v0 = vadd.f32 %v4058_v40, %v1388_v3 }
 0x21f   :  { %v1557_v61 = vpop.f32.mrf.mxu0 }
 0x220   :  { %v1558_v63 = vadd.f32 %v1557_v61, %v1383_v37 }
 0x222   :  { %v4061_v14 = vpop.f32.mrf.mxu0  ;;  %v4111_v54 = vpop.f32.mrf.mxu1 }
 0x223   :  { %v1845_v8 = vadd.f32 %v4111_v54, %v1548_v25  ;;  %v1588_v47 = vadd.f32 %v4061_v14, %v1398_v41 }
 0x224   :  { %v1577_v10 = vpop.f32.mrf.mxu0  ;;  %v1838_v23 = vpop.f32.mrf.mxu1 }
 0x225   :  { %v1839_v15 = vadd.f32 %v1838_v23, %v1538_v9  ;;  %v1578_v62 = vadd.f32 %v1577_v10, %v1393_v49 }
 0x228   :  { %v4064_v42 = vpop.f32.mrf.mxu0  ;;  %v4114_v38 = vpop.f32.mrf.mxu1 }
 0x229   :  { %v1857_v17 = vadd.f32 %v4114_v38, %v1568_v0  ;;  %v1608_v60 = vadd.f32 %v4064_v42, %v1408_v6 }
 0x22a   :  { %v1597_v13 = vpop.f32.mrf.mxu0  ;;  %v1850_v11 = vpop.f32.mrf.mxu1 }
 0x22b   :  { %v1851_v53 = vadd.f32 %v1850_v11, %v1558_v63  ;;  %v1598_v43 = vadd.f32 %v1597_v13, %v1403_v1 }
 0x22e   :  { %v4067_v51 = vpop.f32.mrf.mxu0  ;;  %v4117_v33 = vpop.f32.mrf.mxu1 }
 0x22f   :  { %v1869_v12 = vadd.f32 %v4117_v33, %v1588_v47  ;;  %v1628_v55 = vadd.f32 %v4067_v51, %v1418_v35 }
 0x230   :  { %v1617_v34 = vpop.f32.mrf.mxu0  ;;  %v1862_v56 = vpop.f32.mrf.mxu1 }
 0x231   :  { %v1863_v26 = vadd.f32 %v1862_v56, %v1578_v62  ;;  %v1618_v50 = vadd.f32 %v1617_v34, %v1413_v5 }
 0x234   :  { %v4070_v29 = vpop.f32.mrf.mxu0  ;;  %v4120_v39 = vpop.f32.mrf.mxu1 }
 0x235   :  { %v5905_v16 = vadd.f32 %v4120_v39, %v1608_v60  ;;  %v1648_v57 = vadd.f32 %v4070_v29, %v1428_v36 }
 0x236   :  { %v1637_v52 = vpop.f32.mrf.mxu0  ;;  %v1874_v58 = vpop.f32.mrf.mxu1 }
 0x237   :  { %v5907_v19 = vadd.f32 %v1874_v58, %v1598_v43  ;;  %v1638_v6 = vadd.f32 %v1637_v52, %v1423_v7 }
 0x23a   :  { %v4073_v22 = vpop.f32.mrf.mxu0  ;;  %v4123_v45 = vpop.f32.mrf.mxu1 }
 0x23b   :  { %v5909_v32 = vadd.f32 %v4123_v45, %v1628_v55  ;;  %v1668_v36 = vadd.f32 %v4073_v22, %v5899_v28 }
 0x23c   :  { %v1657_v18 = vpop.f32.mrf.mxu0  ;;  %v1886_v2 = vpop.f32.mrf.mxu1 }
 0x23d   :  { %v5911_v48 = vadd.f32 %v1886_v2, %v1618_v50  ;;  %v1658_v7 = vadd.f32 %v1657_v18, %v5901_v20 }
 0x240   :  { %v5913_v31 = vpop.f32.mrf.mxu0  ;;  %v4126_v24 = vpop.f32.mrf.mxu1 }
 0x241   :  { %v5915_v1 = vadd.f32 %v4126_v24, %v1648_v57  ;;  %v1688_v59 = vadd.f32 %v5913_v31, %v5895_v46 }
 0x242   :  { %v5921_v35 = vpop.f32.mrf.mxu0  ;;  %v1898_v5 = vpop.f32.mrf.mxu1 }
 0x243   :  { %v5923_v41 = vadd.f32 %v1898_v5, %v1638_v6 }
 0x246   :  { %v4129_v49 = vpop.f32.mrf.mxu1  ;;  %v4167_v21 = vpop.f32.mrf.mxu0 }
 0x247   :  { %v5927_v3 = vadd.f32 %v4129_v49, %v1668_v36  ;;  %v2040_v44 = vadd.f32 %v4167_v21, %v1845_v8 }
 0x248   :  { %v1910_v37 = vpop.f32.mrf.mxu1  ;;  %v2032_v40 = vpop.f32.mrf.mxu0 }
 0x249   :  { %v5929_v61 = vadd.f32 %v1910_v37, %v1658_v7  ;;  %v2033_v4 = vadd.f32 %v2032_v40, %v1839_v15 }
 0x24c   :  { %v5931_v30 = vpop.f32.mrf.mxu1  ;;  %v4170_v25 = vpop.f32.mrf.mxu0 }
 0x24d   :  { %v2054_v14 = vadd.f32 %v4170_v25, %v1857_v17 }
 0x24e   :  { %v5933_v54 = vpop.f32.mrf.mxu1  ;;  %v2046_v9 = vpop.f32.mrf.mxu0 }
 0x24f   :  { %v2047_v28 = vadd.f32 %v2046_v9, %v1851_v53 }
 0x252   :  { %v4173_v10 = vpop.f32.mrf.mxu0  ;;  %v4223_v23 = vpop.f32.mrf.mxu1 }
 0x253   :  { %v2068_v0 = vadd.f32 %v4173_v10, %v1869_v12  ;;  %v5935_v20 = vadd.f32 %v4223_v23, %v2040_v44 }
 0x254   :  { %v2060_v42 = vpop.f32.mrf.mxu0  ;;  %v2226_v8 = vpop.f32.mrf.mxu1 }
 0x255   :  { %6542 = vst [vmem:[#allocation6_spill] sm:$0xff] %v5935_v20  ;;  %v2061_v38 = vadd.f32 %v2060_v42, %v1863_v26  ;;  %v5937_v63 = vadd.f32 %v2226_v8, %v2033_v4 }
 0x257   :  { %6543 = vst [vmem:[#allocation16_spill] sm:$0xff] %v5937_v63  ;;  %v1678_v63 = vadd.f32 %v5921_v35, %v5897_v27 }
 0x258   :  { %v5939_v13 = vpop.f32.mrf.mxu0  ;;  %v4226_v15 = vpop.f32.mrf.mxu1 }
 0x259   :  { %v5941_v11 = vadd.f32 %v4226_v15, %v2054_v14  ;;  %v1923_v46 = vadd.f32 %v5933_v54, %v1678_v63  ;;  %v2082_v31 = vadd.f32 %v5939_v13, %v5905_v16 }
 0x25a   :  { %v5943_v17 = vpop.f32.mrf.mxu0  ;;  %v2242_v47 = vpop.f32.mrf.mxu1 }
 0x25b   :  { %v5945_v51 = vadd.f32 %v2242_v47, %v2047_v28 }
 0x25d   :  { %6544 = vst [vmem:[#allocation18_spill] sm:$0xff] %v5945_v51 }
 0x25e   :  { %v4179_v53 = vpop.f32.mrf.mxu0  ;;  %v4229_v33 = vpop.f32.mrf.mxu1 }
 0x25f   :  { %v5947_v62 = vadd.f32 %v4229_v33, %v2068_v0 }
 0x260   :  { %v5949_v12 = vpop.f32.mrf.mxu0  ;;  %v2258_v34 = vpop.f32.mrf.mxu1 }
 0x261   :  { %v5951_v56 = vadd.f32 %v2258_v34, %v2061_v38 }
 0x264   :  { %v4182_v26 = vpop.f32.mrf.mxu0  ;;  %v5953_v60 = vpop.f32.mrf.mxu1 }
 0x266   :  { %v2102_v29 = vpop.f32.mrf.mxu0  ;;  %v5955_v39 = vpop.f32.mrf.mxu1 }
 0x267   :  { %v2103_v20 = vadd.f32 %v2102_v29, %v5923_v41  ;;  %v2089_v41 = vadd.f32 %v5949_v12, %v5911_v48 }
 0x26a   :  { %v4185_v43 = vpop.f32.mrf.mxu0  ;;  %v4235_v52 = vpop.f32.mrf.mxu1 }
 0x26c   :  { %v2116_v58 = vpop.f32.mrf.mxu0  ;;  %v5957_v55 = vpop.f32.mrf.mxu1 }
 0x270   :  { %v4188_v22 = vpop.f32.mrf.mxu0  ;;  %v4238_v45 = vpop.f32.mrf.mxu1 }
 0x272   :  { %v2130_v50 = vpop.f32.mrf.mxu0  ;;  %v2306_v18 = vpop.f32.mrf.mxu1 }
 0x273   :  { %v2307_v27 = vadd.f32 %v2306_v18, %v2103_v20  ;;  %v2131_v29 = vadd.f32 %v2130_v50, %v1923_v46  ;;  %v2291_v20 = vadd.f32 %v5957_v55, %v2089_v41 }
 0x276   :  { %v4241_v2 = vpop.f32.mrf.mxu1  ;;  %v5959_v57 = vpop.f32.mrf.mxu0 }
 0x277   :  { %6545 = vst [vmem:[#allocation15_spill] sm:$0xff] %v5959_v57 }
 0x278   :  { %v2322_v24 = vpop.f32.mrf.mxu1  ;;  %v5961_v6 = vpop.f32.mrf.mxu0 }
 0x279   :  { %6546 = vst [vmem:[#allocation13_spill] sm:$0xff] %v5961_v6  ;;  %v2124_v6 = vadd.f32 %v4185_v43, %v5927_v3 }
 0x27a   :  { %v5963_v5 = vpop.f32.mrf.mxu0 }
 0x27b   :  { %v4244_v36 = vpop.f32.mrf.mxu1 }
 0x27c   :  { %v5965_v49 = vpop.f32.mrf.mxu0 }
 0x27d   :  { %6547 = vst [vmem:[#allocation14_spill] sm:$0xff] %v5965_v49  ;;  %v2338_v21 = vpop.f32.mrf.mxu1  ;;  %v2331_v49 = vadd.f32 %v4241_v2, %v2124_v6 }
 0x27e   :  { %v5967_v7 = vpop.f32.mrf.mxu0  ;;  %v2339_v13 = vadd.f32 %v2338_v21, %v2131_v29 }
 0x27f   :  { %v5969_v44 = vpop.f32.mrf.mxu1 }
 0x280   :  { %6548 = vst [vmem:[#allocation7_spill] sm:$0xff] %v5969_v44  ;;  %v5971_v37 = vpop.f32.mrf.mxu0  ;;  %v2110_v44 = vadd.f32 %v4182_v26, %v5915_v1  ;;  %v2096_v1 = vadd.f32 %v4179_v53, %v5909_v32  ;;  %v2075_v32 = vadd.f32 %v5943_v17, %v5907_v19 }
 0x281   :  { %v5973_v40 = vpop.f32.mrf.mxu1 }
 0x282   :  { %6549 = vst [vmem:[#allocation9_spill] sm:$0xff] %v5973_v40  ;;  %v5975_v4 = vpop.f32.mrf.mxu0  ;;  %v2275_v17 = vadd.f32 %v5955_v39, %v2075_v32 }
 0x283   :  { %v5977_v25 = vpop.f32.mrf.mxu1 }
 0x284   :  { %6550 = vst [vmem:[#allocation8_spill] sm:$0xff] %v5977_v25  ;;  %v5979_v14 = vpop.f32.mrf.mxu0  ;;  %v2117_v25 = vadd.f32 %v2116_v58, %v5929_v61  ;;  %v2299_v61 = vadd.f32 %v4235_v52, %v2096_v1  ;;  %v2283_v52 = vadd.f32 %v5953_v60, %v2082_v31 }
 0x285   :  { %v5981_v9 = vpop.f32.mrf.mxu1 }
 0x286   :  { %6551 = vst [vmem:[#allocation10_spill] sm:$0xff] %v5981_v9  ;;  %v4291_v28 = vpop.f32.mrf.mxu0  ;;  %v1929_v9 = vadd.f32 %v5931_v30, %v1688_v59  ;;  %v2323_v35 = vadd.f32 %v2322_v24, %v2117_v25  ;;  %v2508_v55 = vadd.f32 %v5975_v4, %v2283_v52  ;;  %v2484_v4 = vadd.f32 %v5963_v5, %v5941_v11 }
 0x287   :  { %v5983_v10 = vpop.f32.mrf.mxu1  ;;  %v2520_v53 = vadd.f32 %v4291_v28, %v2299_v61  ;;  %v2490_v11 = vadd.f32 %v5971_v37, %v5951_v56  ;;  %v6554_v56 = vld [vmem:[#allocation18_spill] sm:$0xff] }
 0x288   :  { %v2513_v23 = vpop.f32.mrf.mxu0  ;;  %v2138_v3 = vadd.f32 %v4188_v22, %v1929_v9  ;;  %v6555_v37 = vld [vmem:[#allocation14_spill] sm:$0xff] }
 0x289   :  { %v5985_v0 = vpop.f32.mrf.mxu1  ;;  %v2514_v50 = vadd.f32 %v2513_v23, %v2291_v20  ;;  %v2502_v23 = vadd.f32 %v5979_v14, %v2275_v17  ;;  %v2752_v17 = vld [vmem:[%s6425_s5] sm:$0xff]  ;;  %s4598_s5 = smov [#allocation2]  }
 0x28a   :  { %6552 = vst [vmem:[#allocation12_spill] sm:$0xff] %v5985_v0  ;;  %v4294_v42 = vpop.f32.mrf.mxu0  ;;  %v2315_v0 = vadd.f32 %v4238_v45, %v2110_v44  ;;  %v2347_v43 = vadd.f32 %v4244_v36, %v2138_v3  ;;  %s3407_s9 = sshll.u32 %s4598_s5, 4  ;;  %s3408_s9 = int_to_ptr.vmem [resolvable:$true] %s3407_s9 }
 0x28b   :  { %v5987_v8 = vpop.f32.mrf.mxu1  ;;  %s4573_s10 = scalar_lea.vmem %s3408_s9, 128  ;;  %p4578_p1 = scmp.lt.s32.totalorder %s3408_s9, %s3408_s9 }
 0x28c   :  { %v2525_v38 = vpop.f32.mrf.mxu0  ;;  %v2532_v59 = vadd.f32 %v4294_v42, %v2315_v0  ;;  %v6018_v42 = vadd.f32 %v5987_v8, %v2508_v55  ;;  %v6561_v55 = vld [vmem:[#allocation16_spill] sm:$0xff]  ;;  %p4574_p0 = scmp.ne.s32.totalorder %s3408_s9, %s4573_s10  ;;  %p4579_p2 = scmp.lt.s32.totalorder %s4573_s10, %s4573_s10 }
 0x28d   :  { %v5989_v15 = vpop.f32.mrf.mxu1  ;;  %v2526_v45 = vadd.f32 %v2525_v38, %v2307_v27  ;;  %v6560_v52 = vld [vmem:[#allocation10_spill] sm:$0xff] }
 0x28e   :  { %v4297_v47 = vpop.f32.mrf.mxu0  ;;  %v6032_v14 = vadd.f32 %v5989_v15, %v2502_v23  ;;  %v2743_v5 = vmax.f32 %v6018_v42, 0.0  ;;  %v6553_v15 = vmov 0.0   ;;  %p4580_p3 = por %p4579_p2, %p4578_p1 }
 0x28f   :  { %v4347_v33 = vpop.f32.mrf.mxu1  ;;  %v2544_v30 = vadd.f32 %v4297_v47, %v2331_v49 }
 0x290   :  { %v2537_v34 = vpop.f32.mrf.mxu0  ;;  %v2697_v6 = vadd.f32 %v4347_v33, %v2520_v53  ;;  %v2742_v61 = vmax.f32 %v6032_v14, 0.0  ;;  %v6085_v32 = vand.u32 4294901760, %v2743_v5  ;;  %p4581_p4 = pnand %p4580_p3, %p4574_p0 }
 0x291   :  { %v2690_v40 = vpop.f32.mrf.mxu1  ;;  %v2538_v54 = vadd.f32 %v2537_v34, %v2323_v35  ;;  %v2496_v34 = vadd.f32 %v5967_v7, %v5947_v62 }
 0x292   :  { %v4300_v51 = vpop.f32.mrf.mxu0  ;;  %v2691_v21 = vadd.f32 %v2690_v40, %v2514_v50  ;;  %v2745_v38 = vmax.f32 %v2697_v6, 0.0  ;;  %v6130_v42 = vsub.f32 %v2743_v5, %v6085_v32 }
 0x293   :  { %v4350_v57 = vpop.f32.mrf.mxu1  ;;  %v2556_v18 = vadd.f32 %v4300_v51, %v2347_v43  ;;  %v6048_v62 = vadd.f32 %v5983_v10, %v2496_v34  ;;  %v2478_v10 = vadd.f32 %v6555_v37, %v6554_v56  ;;  %v6564_v34 = vld [vmem:[#allocation9_spill] sm:$0xff] }
 0x294   :  { %v2709_v63 = vadd.f32 %v4350_v57, %v2532_v59  ;;  %v2549_v2 = vpop.f32.mrf.mxu0  ;;  %v2744_v8 = vmax.f32 %v2691_v21, 0.0  ;;  %v6051_v7 = vand.u32 4294901760, %v2745_v38  ;;  %v6562_v21 = vld [vmem:[#allocation13_spill] sm:$0xff] }
 0x295   :  { %v2702_v26 = vpop.f32.mrf.mxu1  ;;  %v2550_v36 = vadd.f32 %v2549_v2, %v2339_v13  ;;  %v6102_v50 = vadd.f32 %v6560_v52, %v2478_v10 }
 0x296   :  { %v2703_v24 = vadd.f32 %v2702_v26, %v2526_v45  ;;  %v2747_v49 = vmax.f32 %v2709_v63, 0.0  ;;  %v6069_v29 = vand.u32 4294901760, %v2744_v8  ;;  %v6557_v63 = vld [vmem:[#allocation8_spill] sm:$0xff]  ;;  %v6088_v20 = vsub.f32 %v2745_v38, %v6051_v7 }
 0x297   :  { %v4353_v58 = vpop.f32.mrf.mxu1  ;;  %v6082_v2 = vadd.f32 %v6557_v63, %v2484_v4 }
 0x298   :  { %v2721_v16 = vadd.f32 %v4353_v58, %v2544_v30  ;;  %v2746_v9 = vmax.f32 %v2703_v24, 0.0  ;;  %v6020_v47 = vand.u32 4294901760, %v2747_v49  ;;  %v6556_v30 = vld [vmem:[#allocation12_spill] sm:$0xff]  ;;  %v6558_v24 = vld [vmem:[#allocation6_spill] sm:$0xff]  ;;  %v2895_v38 = vand.u32 4294901760, %v6088_v20 }
 0x299   :  { %v2714_v22 = vpop.f32.mrf.mxu1  ;;  %v6066_v41 = vadd.f32 %v6556_v30, %v2490_v11 }
 0x29a   :  { %v2749_v48 = vmax.f32 %v2721_v16, 0.0  ;;  %v2715_v12 = vadd.f32 %v2714_v22, %v2538_v54  ;;  %v6034_v46 = vand.u32 4294901760, %v2746_v9  ;;  %v6055_v26 = vsub.f32 %v2747_v49, %v6020_v47 }
 0x29b   :  { %v4356_v57 = vpop.f32.mrf.mxu1  ;;  %v2741_v16 = vmax.f32 %v6048_v62, 0.0  ;;  %v2740_v6 = vmax.f32 %v6066_v41, 0.0  ;;  %v6145_v62 = vand.u32 4294901760, %v2752_v17  ;;  %v2896_v63 = vsub.f32 %v6088_v20, %v2895_v38 }
 0x29c   :  { %v6010_v44 = vand.u32 4294901760, %v2749_v48  ;;  %v2748_v25 = vmax.f32 %v2715_v12, 0.0  ;;  %v2733_v19 = vadd.f32 %v4356_v57, %v2556_v18  ;;  %v6073_v43 = vsub.f32 %v2746_v9, %v6034_v46  ;;  %v6563_v9 = vld [vmem:[#allocation7_spill] sm:$0xff] }
 0x29d   :  { %v2726_v51 = vpop.f32.mrf.mxu1  ;;  %v2881_v13 = vand.u32 4294901760, %v6055_v26  ;;  %v6109_v57 = vsub.f32 %v2744_v8, %v6069_v29  ;;  %v6125_v23 = vand.u32 4294901760, %v2741_v16  ;;  %v2738_v8 = vmax.f32 %v6102_v50, 0.0 }
 0x29e   :  { %v6014_v28 = vand.u32 4294901760, %v2748_v25  ;;  %v2751_v0 = vmax.f32 %v2733_v19, 0.0  ;;  %v2727_v60 = vadd.f32 %v2726_v51, %v2550_v36  ;;  %v6023_v33 = vsub.f32 %v2749_v48, %v6010_v44  ;;  %v6559_v48 = vld [vmem:[#allocation15_spill] sm:$0xff] }
 0x29f   :  { %v2472_v12 = vadd.f32 %v6559_v48, %v6558_v24  ;;  %v6105_v36 = vand.u32 4294901760, %v2742_v61  ;;  %v2888_v49 = vand.u32 4294901760, %v6073_v43  ;;  %v2466_v51 = vadd.f32 %v6562_v21, %v6561_v55 }
 0x2a0   :  { %v6025_v39 = vand.u32 4294901760, %v2751_v0  ;;  %v2750_v40 = vmax.f32 %v2727_v60, 0.0  ;;  %v6037_v31 = vsub.f32 %v2748_v25, %v6014_v28  ;;  %v2867_v27 = vand.u32 4294901760, %v6023_v33 }
 0x2a1   :  { %v2739_v60 = vmax.f32 %v6082_v2, 0.0  ;;  %v6138_v14 = vadd.f32 %v6564_v34, %v2466_v51  ;;  %v6141_v11 = vand.u32 4294901760, %v2740_v6  ;;  %v6148_v5 = vsub.f32 %v2742_v61, %v6105_v36 }
 0x2a2   :  { %v6040_v1 = vsub.f32 %v2751_v0, %v6025_v39  ;;  %v6042_v3 = vand.u32 4294901760, %v2750_v40  ;;  %4358 = vmatpush3.msra.mxu0 %v6025_v39  ;;  %v2874_v58 = vand.u32 4294901760, %v6037_v31  ;;  %v2868_v53 = vsub.f32 %v6023_v33, %v2867_v27 }
 0x2a3   :  { %4359 = vmatprep.subr.mxu0 %v6553_v15  ;;  %v6122_v0 = vadd.f32 %v6563_v9, %v2472_v12  ;;  %v2902_v56 = vand.u32 4294901760, %v6109_v57  ;;  %v2889_v37 = vsub.f32 %v6073_v43, %v2888_v49  ;;  %v6156_v41 = vand.u32 4294901760, %v2739_v60 }
 0x2a4   :  { %v2853_v35 = vand.u32 4294901760, %v6040_v1  ;;  %v6060_v59 = vsub.f32 %v2750_v40, %v6042_v3  ;;  %4360 = vmatpush3.msra.mxu0 %v6042_v3  ;;  %v2875_v25 = vsub.f32 %v6037_v31, %v2874_v58  ;;  %v2882_v40 = vsub.f32 %v6055_v26, %v2881_v13 }
 0x2a5   :  { %4361 = vmatprep.subr.mxu0 %v6553_v15  ;;  %v2869_v4 = vand.u32 4294901760, %v2868_v53  ;;  %v2737_v30 = vmax.f32 %v6122_v0, 0.0  ;;  %v6161_v61 = vsub.f32 %v2741_v16, %v6125_v23  ;;  %v2736_v53 = vmax.f32 %v6138_v14, 0.0 }
 0x2a6   :  { %v2854_v45 = vsub.f32 %v6040_v1, %v2853_v35  ;;  %v2860_v54 = vand.u32 4294901760, %v6060_v59  ;;  %4362 = vmatpush3.msra.mxu0 %v6010_v44  ;;  %v2876_v10 = vand.u32 4294901760, %v2875_v25  ;;  %v2883_v2 = vand.u32 4294901760, %v2882_v40 }
 0x2a7   :  { %4363 = vmatprep.subr.mxu0 %v6553_v15  ;;  %v6174_v16 = vsub.f32 %v2752_v17, %v6145_v62  ;;  %v2916_v24 = vand.u32 4294901760, %v6148_v5  ;;  %v2903_v48 = vsub.f32 %v6109_v57, %v2902_v56  ;;  %v2890_v12 = vand.u32 4294901760, %v2889_v37 }
 0x2a8   :  { %v2861_v22 = vsub.f32 %v6060_v59, %v2860_v54  ;;  %4364 = vmatpush3.msra.mxu0 %v6014_v28  ;;  %v2855_v18 = vand.u32 4294901760, %v2854_v45  ;;  %v2909_v45 = vand.u32 4294901760, %v6130_v42  ;;  %v6184_v52 = vand.u32 4294901760, %v2737_v30 }
 0x2a9   :  { %4365 = vmatprep.subr.mxu0 %v6553_v15  ;;  %v6189_v50 = vsub.f32 %v2739_v60, %v6156_v41  ;;  %v6196_v17 = vand.u32 4294901760, %v2736_v53  ;;  %v2842_v55 = vand.u32 4294901760, %v6174_v16  ;;  %v2917_v9 = vsub.f32 %v6148_v5, %v2916_v24 }
 0x2aa   :  { %4366 = vmatpush3.msra.mxu0 %v6020_v47  ;;  %4393 = vmatpush3.msra.mxu1 %v2855_v18  ;;  %v2862_v19 = vand.u32 4294901760, %v2861_v22  ;;  %v6169_v22 = vand.u32 4294901760, %v2738_v8  ;;  %v6177_v18 = vsub.f32 %v2740_v6, %v6141_v11  ;;  %v2923_v6 = vand.u32 4294901760, %v6161_v61 }
 0x2ab   :  { %4367 = vmatprep.subr.mxu0 %v6553_v15  ;;  %4394 = vmatprep.subr.mxu1 %v6553_v15  ;;  %v2910_v25 = vsub.f32 %v6130_v42, %v2909_v45  ;;  %v2904_v0 = vand.u32 4294901760, %v2903_v48  ;;  %v6212_v60 = vsub.f32 %v2737_v30, %v6184_v52  ;;  %v2937_v40 = vand.u32 4294901760, %v6189_v50 }
 0x2ac   :  { %4368 = vmatpush3.msra.mxu0 %v6034_v46  ;;  %4395 = vmatpush3.msra.mxu1 %v2862_v19  ;;  %v2897_v19 = vand.u32 4294901760, %v2896_v63  ;;  %v6202_v21 = vsub.f32 %v2738_v8, %v6169_v22  ;;  %v2930_v51 = vand.u32 4294901760, %v6177_v18  ;;  %v2843_v14 = vsub.f32 %v6174_v16, %v2842_v55 }
 0x2ad   :  { %4369 = vmatprep.subr.mxu0 %v6553_v15  ;;  %4396 = vmatprep.subr.mxu1 %v6553_v15  ;;  %v2911_v34 = vand.u32 4294901760, %v2910_v25  ;;  %v6225_v8 = vsub.f32 %v2736_v53, %v6196_v17  ;;  %v2918_v30 = vand.u32 4294901760, %v2917_v9  ;;  %v2951_v63 = vand.u32 4294901760, %v6212_v60 }
 0x2ae   :  { %4370 = vmatpush3.msra.mxu0 %v6051_v7  ;;  %4397 = vmatpush3.msra.mxu1 %v2869_v4  ;;  %v2924_v4 = vsub.f32 %v6161_v61, %v2923_v6  ;;  %v2944_v37 = vand.u32 4294901760, %v6202_v21  ;;  %v2844_v48 = vand.u32 4294901760, %v2843_v14 }
 0x2af   :  { %4371 = vmatprep.subr.mxu0 %v6553_v15  ;;  %4398 = vmatprep.subr.mxu1 %v6553_v15  ;;  %v2952_v9 = vsub.f32 %v6212_v60, %v2951_v63 }
 0x2b0   :  { %4372 = vmatpush3.msra.mxu0 %v6069_v29  ;;  %4399 = vmatpush3.msra.mxu1 %v2876_v10  ;;  %v2931_v10 = vsub.f32 %v6177_v18, %v2930_v51  ;;  %v2925_v53 = vand.u32 4294901760, %v2924_v4  ;;  %v2945_v25 = vsub.f32 %v6202_v21, %v2944_v37 }
 0x2b1   :  { %4373 = vmatprep.subr.mxu0 %v6553_v15  ;;  %4400 = vmatprep.subr.mxu1 %v6553_v15  ;;  %v2953_v14 = vand.u32 4294901760, %v2952_v9 }
 0x2b2   :  { %4374 = vmatpush3.msra.mxu0 %v6085_v32  ;;  %4401 = vmatpush3.msra.mxu1 %v2883_v2  ;;  %v2938_v2 = vsub.f32 %v6189_v50, %v2937_v40 }
 0x2b3   :  { %4375 = vmatprep.subr.mxu0 %v6553_v15  ;;  %4402 = vmatprep.subr.mxu1 %v6553_v15 }
 0x2b4   :  { %4376 = vmatpush3.msra.mxu0 %v6105_v36  ;;  %4403 = vmatpush3.msra.mxu1 %v2890_v12  ;;  %v2958_v12 = vand.u32 4294901760, %v6225_v8 }
 0x2b5   :  { %4377 = vmatprep.subr.mxu0 %v6553_v15  ;;  %4404 = vmatprep.subr.mxu1 %v6553_v15 }
 0x2b6   :  { %4378 = vmatpush3.msra.mxu0 %v6125_v23  ;;  %4405 = vmatpush3.msra.mxu1 %v2897_v19  ;;  %v2932_v19 = vand.u32 4294901760, %v2931_v10  ;;  %v2959_v4 = vsub.f32 %v6225_v8, %v2958_v12 }
 0x2b7   :  { %4379 = vmatprep.subr.mxu0 %v6553_v15  ;;  %4406 = vmatprep.subr.mxu1 %v6553_v15 }
 0x2b8   :  { %4380 = vmatpush3.msra.mxu0 %v6141_v11  ;;  %4407 = vmatpush3.msra.mxu1 %v2904_v0  ;;  %v2939_v0 = vand.u32 4294901760, %v2938_v2  ;;  %v2960_v10 = vand.u32 4294901760, %v2959_v4 }
 0x2b9   :  { %4381 = vmatprep.subr.mxu0 %v6553_v15  ;;  %4408 = vmatprep.subr.mxu1 %v6553_v15 }
 0x2ba   :  { %4382 = vmatpush3.msra.mxu0 %v6156_v41  ;;  %4409 = vmatpush3.msra.mxu1 %v2911_v34  ;;  %v2946_v34 = vand.u32 4294901760, %v2945_v25 }
 0x2bb   :  { %4383 = vmatprep.subr.mxu0 %v6553_v15  ;;  %4410 = vmatprep.subr.mxu1 %v6553_v15 }
 0x2bc   :  { %4384 = vmatpush3.msra.mxu0 %v6169_v22  ;;  %4411 = vmatpush3.msra.mxu1 %v2918_v30 }
 0x2bd   :  { %4385 = vmatprep.subr.mxu0 %v6553_v15  ;;  %4412 = vmatprep.subr.mxu1 %v6553_v15 }
 0x2be   :  { %4386 = vmatpush3.msra.mxu0 %v6184_v52  ;;  %4413 = vmatpush3.msra.mxu1 %v2925_v53 }
 0x2bf   :  { %4387 = vmatprep.subr.mxu0 %v6553_v15  ;;  %4414 = vmatprep.subr.mxu1 %v6553_v15 }
 0x2c0   :  { %4388 = vmatpush3.msra.mxu0 %v6196_v17  ;;  %4415 = vmatpush3.msra.mxu1 %v2932_v19 }
 0x2c1   :  { %4390 = vmatmul.mubr.f32.vlgmr.msra.gmra.mxu0 %v2844_v48  ;;  %4416 = vmatprep.subr.mxu1 %v6553_v15 }
 0x2c2   :  { %4427 = vmatprep.subr.mxu0 %v6553_v15  ;;  %4417 = vmatpush3.msra.mxu1 %v2939_v0 }
 0x2c3   :  { %4428 = vmatpush3.msra.mxu0 %v6040_v1  ;;  %4418 = vmatprep.subr.mxu1 %v6553_v15 }
 0x2c4   :  { %4429 = vmatprep.subr.mxu0 %v6553_v15  ;;  %4419 = vmatpush3.msra.mxu1 %v2946_v34 }
 0x2c5   :  { %4430 = vmatpush3.msra.mxu0 %v6060_v59  ;;  %4420 = vmatprep.subr.mxu1 %v6553_v15 }
 0x2c6   :  { %4431 = vmatprep.subr.mxu0 %v6553_v15  ;;  %4421 = vmatpush3.msra.mxu1 %v2953_v14 }
 0x2c7   :  { %4432 = vmatpush3.msra.mxu0 %v6023_v33  ;;  %4422 = vmatprep.subr.mxu1 %v6553_v15 }
 0x2c8   :  { %4433 = vmatprep.subr.mxu0 %v6553_v15  ;;  %4423 = vmatpush3.msra.mxu1 %v2960_v10 }
 0x2c9   :  { %4434 = vmatpush3.msra.mxu0 %v6037_v31  ;;  %4425 = vmatmul.mubr.f32.vlgmr.msra.gmra.mxu1 %v6145_v62 }
 0x2ca   :  { %4435 = vmatprep.subr.mxu0 %v6553_v15  ;;  %4462 = vmatprep.subr.mxu1 %v6553_v15 }
 0x2cb   :  { %4436 = vmatpush3.msra.mxu0 %v6055_v26  ;;  %4463 = vmatpush3.msra.mxu1 %v6025_v39 }
 0x2cc   :  { %4437 = vmatprep.subr.mxu0 %v6553_v15  ;;  %4464 = vmatprep.subr.mxu1 %v6553_v15 }
 0x2cd   :  { %4438 = vmatpush3.msra.mxu0 %v6073_v43  ;;  %4465 = vmatpush3.msra.mxu1 %v6042_v3 }
 0x2ce   :  { %4439 = vmatprep.subr.mxu0 %v6553_v15  ;;  %4466 = vmatprep.subr.mxu1 %v6553_v15 }
 0x2cf   :  { %4440 = vmatpush3.msra.mxu0 %v6088_v20  ;;  %4467 = vmatpush3.msra.mxu1 %v6010_v44 }
 0x2d0   :  { %4441 = vmatprep.subr.mxu0 %v6553_v15  ;;  %4468 = vmatprep.subr.mxu1 %v6553_v15 }
 0x2d1   :  { %4442 = vmatpush3.msra.mxu0 %v6109_v57  ;;  %4469 = vmatpush3.msra.mxu1 %v6014_v28 }
 0x2d2   :  { %4443 = vmatprep.subr.mxu0 %v6553_v15  ;;  %4470 = vmatprep.subr.mxu1 %v6553_v15 }
 0x2d3   :  { %4444 = vmatpush3.msra.mxu0 %v6130_v42  ;;  %4471 = vmatpush3.msra.mxu1 %v6020_v47 }
 0x2d4   :  { %4445 = vmatprep.subr.mxu0 %v6553_v15  ;;  %4472 = vmatprep.subr.mxu1 %v6553_v15 }
 0x2d5   :  { %4446 = vmatpush3.msra.mxu0 %v6148_v5  ;;  %4473 = vmatpush3.msra.mxu1 %v6034_v46 }
 0x2d6   :  { %4447 = vmatprep.subr.mxu0 %v6553_v15  ;;  %4474 = vmatprep.subr.mxu1 %v6553_v15 }
 0x2d7   :  { %4448 = vmatpush3.msra.mxu0 %v6161_v61  ;;  %4475 = vmatpush3.msra.mxu1 %v6051_v7 }
 0x2d8   :  { %4449 = vmatprep.subr.mxu0 %v6553_v15  ;;  %4476 = vmatprep.subr.mxu1 %v6553_v15 }
 0x2d9   :  { %4450 = vmatpush3.msra.mxu0 %v6177_v18  ;;  %4477 = vmatpush3.msra.mxu1 %v6069_v29 }
 0x2da   :  { %4451 = vmatprep.subr.mxu0 %v6553_v15  ;;  %4478 = vmatprep.subr.mxu1 %v6553_v15 }
 0x2db   :  { %4452 = vmatpush3.msra.mxu0 %v6189_v50  ;;  %4479 = vmatpush3.msra.mxu1 %v6085_v32 }
 0x2dc   :  { %4453 = vmatprep.subr.mxu0 %v6553_v15  ;;  %4480 = vmatprep.subr.mxu1 %v6553_v15 }
 0x2dd   :  { %4454 = vmatpush3.msra.mxu0 %v6202_v21  ;;  %4481 = vmatpush3.msra.mxu1 %v6105_v36 }
 0x2de   :  { %4455 = vmatprep.subr.mxu0 %v6553_v15  ;;  %4482 = vmatprep.subr.mxu1 %v6553_v15 }
 0x2df   :  { %4456 = vmatpush3.msra.mxu0 %v6212_v60  ;;  %4483 = vmatpush3.msra.mxu1 %v6125_v23 }
 0x2e0   :  { %4457 = vmatprep.subr.mxu0 %v6553_v15  ;;  %4484 = vmatprep.subr.mxu1 %v6553_v15 }
 0x2e1   :  { %4458 = vmatpush3.msra.mxu0 %v6225_v8  ;;  %4459 = vmatprep.mubr.msk.f32.mxu0 %vm4597_vm1, %v6553_v15 }
 0x2e2   :  { %4485 = vmatpush3.msra.mxu1 %v6141_v11  ;;  %4460 = vmatmul.mubr.f32.vlgmr.msra.gmra.mxu0 %v6174_v16 }
 0x2e3   :  { %4486 = vmatprep.subr.mxu1 %v6553_v15  ;;  %4497 = vmatprep.subr.mxu0 %v6553_v15 }
 0x2e4   :  { %4487 = vmatpush3.msra.mxu1 %v6156_v41  ;;  %4498 = vmatpush3.msra.mxu0 %v2853_v35 }
 0x2e5   :  { %4488 = vmatprep.subr.mxu1 %v6553_v15  ;;  %4499 = vmatprep.subr.mxu0 %v6553_v15 }
 0x2e6   :  { %4489 = vmatpush3.msra.mxu1 %v6169_v22  ;;  %4500 = vmatpush3.msra.mxu0 %v2860_v54 }
 0x2e7   :  { %4490 = vmatprep.subr.mxu1 %v6553_v15  ;;  %4501 = vmatprep.subr.mxu0 %v6553_v15 }
 0x2e8   :  { %4491 = vmatpush3.msra.mxu1 %v6184_v52  ;;  %4502 = vmatpush3.msra.mxu0 %v2867_v27 }
 0x2e9   :  { %4492 = vmatprep.subr.mxu1 %v6553_v15  ;;  %4503 = vmatprep.subr.mxu0 %v6553_v15 }
 0x2ea   :  { %4493 = vmatpush3.msra.mxu1 %v6196_v17  ;;  %4494 = vmatprep.mubr.msk.f32.mxu1 %vm4597_vm1, %v6553_v15 }
 0x2eb   :  { %4504 = vmatpush3.msra.mxu0 %v2874_v58  ;;  %4495 = vmatmul.mubr.f32.vlgmr.msra.gmra.mxu1 %v2842_v55 }
 0x2ec   :  { %4505 = vmatprep.subr.mxu0 %v6553_v15  ;;  %4532 = vmatprep.subr.mxu1 %v6553_v15 }
 0x2ed   :  { %4506 = vmatpush3.msra.mxu0 %v2881_v13  ;;  %4533 = vmatpush3.msra.mxu1 %v6025_v39 }
 0x2ee   :  { %4507 = vmatprep.subr.mxu0 %v6553_v15  ;;  %4534 = vmatprep.subr.mxu1 %v6553_v15 }
 0x2ef   :  { %4508 = vmatpush3.msra.mxu0 %v2888_v49  ;;  %4535 = vmatpush3.msra.mxu1 %v6042_v3  ;;  %v2757_v3 = vpop.permute.xlu0 %2756 }
 0x2f0   :  { %4509 = vmatprep.subr.mxu0 %v6553_v15  ;;  %4536 = vmatprep.subr.mxu1 %v6553_v15 }
 0x2f1   :  { %4510 = vmatpush3.msra.mxu0 %v2895_v38  ;;  %4537 = vmatpush3.msra.mxu1 %v6010_v44 }
 0x2f2   :  { %4511 = vmatprep.subr.mxu0 %v6553_v15  ;;  %4538 = vmatprep.subr.mxu1 %v6553_v15 }
 0x2f3   :  { %4512 = vmatpush3.msra.mxu0 %v2902_v56  ;;  %4539 = vmatpush3.msra.mxu1 %v6014_v28 }
 0x2f4   :  { %4513 = vmatprep.subr.mxu0 %v6553_v15  ;;  %4540 = vmatprep.subr.mxu1 %v6553_v15 }
 0x2f5   :  { %4514 = vmatpush3.msra.mxu0 %v2909_v45  ;;  %4541 = vmatpush3.msra.mxu1 %v6020_v47 }
 0x2f6   :  { %4515 = vmatprep.subr.mxu0 %v6553_v15  ;;  %4542 = vmatprep.subr.mxu1 %v6553_v15 }
 0x2f7   :  { %4516 = vmatpush3.msra.mxu0 %v2916_v24  ;;  %4543 = vmatpush3.msra.mxu1 %v6034_v46 }
 0x2f8   :  { %4517 = vmatprep.subr.mxu0 %v6553_v15  ;;  %4544 = vmatprep.subr.mxu1 %v6553_v15 }
 0x2f9   :  { %4518 = vmatpush3.msra.mxu0 %v2923_v6  ;;  %4545 = vmatpush3.msra.mxu1 %v6051_v7 }
 0x2fa   :  { %4519 = vmatprep.subr.mxu0 %v6553_v15  ;;  %4546 = vmatprep.subr.mxu1 %v6553_v15 }
 0x2fb   :  { %4520 = vmatpush3.msra.mxu0 %v2930_v51  ;;  %4547 = vmatpush3.msra.mxu1 %v6069_v29 }
 0x2fc   :  { %4521 = vmatprep.subr.mxu0 %v6553_v15  ;;  %4548 = vmatprep.subr.mxu1 %v6553_v15 }
 0x2fd   :  { %4522 = vmatpush3.msra.mxu0 %v2937_v40  ;;  %4549 = vmatpush3.msra.mxu1 %v6085_v32 }
 0x2fe   :  { %4523 = vmatprep.subr.mxu0 %v6553_v15  ;;  %4550 = vmatprep.subr.mxu1 %v6553_v15 }
 0x2ff   :  { %4524 = vmatpush3.msra.mxu0 %v2944_v37  ;;  %4551 = vmatpush3.msra.mxu1 %v6105_v36 }
 0x300   :  { %4525 = vmatprep.subr.mxu0 %v6553_v15  ;;  %4552 = vmatprep.subr.mxu1 %v6553_v15 }
 0x301   :  { %4526 = vmatpush3.msra.mxu0 %v2951_v63  ;;  %4553 = vmatpush3.msra.mxu1 %v6125_v23 }
 0x302   :  { %4527 = vmatprep.subr.mxu0 %v6553_v15  ;;  %4554 = vmatprep.subr.mxu1 %v6553_v15 }
 0x303   :  { %4528 = vmatpush3.msra.mxu0 %v2958_v12  ;;  %4529 = vmatprep.mubr.msk.f32.mxu0 %vm4597_vm1, %v6553_v15 }
 0x304   :  { %4555 = vmatpush3.msra.mxu1 %v6141_v11  ;;  %4530 = vmatmul.mubr.f32.vlgmr.msra.gmra.mxu0 %v6145_v62 }
 0x305   :  { %4556 = vmatprep.subr.mxu1 %v6553_v15  ;;  %4564 = vmatprep.mubr.msk.f32.mxu1 %vm4597_vm1, %v6553_v15 }
 0x306   :  { %4557 = vmatpush3.msra.mxu1 %v6156_v41 }
 0x307   :  { %4558 = vmatprep.subr.mxu1 %v6553_v15 }
 0x308   :  { %4559 = vmatpush3.msra.mxu1 %v6169_v22 }
 0x309   :  { %4560 = vmatprep.subr.mxu1 %v6553_v15 }
 0x30a   :  { %4561 = vmatpush3.msra.mxu1 %v6184_v52 }
 0x30b   :  { %4562 = vmatprep.subr.mxu1 %v6553_v15 }
 0x30c   :  { %4563 = vmatpush3.msra.mxu1 %v6196_v17 }
 0x30d   :  { %4565 = vmatmul.mubr.f32.vlgmr.msra.gmra.mxu1 %v6145_v62 }
 0x381   :  { %v2846_v44 = vpop.f32.mrf.mxu0 }
 0x382   :  { %v2847_v7 = vadd.f32 %v2846_v44, %v2757_v3 }
 0x383   :  { %v4391_v28 = vpop.f32.mrf.mxu0 }
 0x389   :  { %v2997_v47 = vpop.f32.mrf.mxu1 }
 0x38a   :  { %v2998_v27 = vadd.f32 %v2997_v47, %v2847_v7 }
 0x38b   :  { %v4426_v33 = vpop.f32.mrf.mxu1 }
 0x3a2   :  { %v3101_v39 = vpop.f32.mrf.mxu0 }
 0x3a3   :  { %v3102_v59 = vadd.f32 %v3101_v39, %v2998_v27 }
 0x3a4   :  { %v4461_v46 = vpop.f32.mrf.mxu0 }
 0x3ab   :  { %v3190_v31 = vpop.f32.mrf.mxu1 }
 0x3ac   :  { %v3191_v29 = vadd.f32 %v3190_v31, %v3102_v59 }
 0x3ad   :  { %v4496_v1 = vpop.f32.mrf.mxu1 }
 0x3c4   :  { %v3309_v26 = vpop.f32.mrf.mxu0 }
 0x3c5   :  { %v3310_v15 = vadd.f32 %v3309_v26, %v3191_v29 }
 0x3c6   :  { %v4531_v35 = vpop.f32.mrf.mxu0 }
 0x3cd   :  { %v3396_v43 = vpop.f32.mrf.mxu1 }
 0x3ce   :  { %v3397_v58 = vadd.f32 %v3396_v43, %v3310_v15 }
 0x3cf   :  { %v4566_v54 = vpop.f32.mrf.mxu1 }
 0x3d0   :  { %3400 = vst [vmem:[#allocation2] sm:$0xff] %v3397_v58 }
 0x3d1   :  { %4584 = shalt.err (!%p4581_p4)
}
 0x3d2   :  { %3410 = dma.vmem_to_hbm [thread:$0]  %s3408_s9, 128, %s6427_s7, [#allocation3]  }
 0x3d3   :  { %4593 = dma.done.wait [#allocation3], 128  }
 0x3d4   :  { %4594 = vsyncadd [#allocation3], 4294967168 }
 0x3d5   :  { %3414 = vsyncpa [#allocation3], 1 }

</bundles_post_ra>
